<compile_context>
chip_gen: v7x
topology: tpu7x:2x2x1
jax: 0.10.0
libtpu: 0.0.40
codegen_flags: <defaults>
</compile_context>

<pallas_src>
import jax
import jax.numpy as jnp
from jax.experimental import pallas as pl
from jax.experimental.pallas import tpu as pltpu

LATENT_DIM = 32
H1, H2, H3 = 128, 256, 512
OUT_DIM = 28 * 28      # 784
OUT_PAD = 896          # 7 * 128 -> lane-dense output stores


def _round_up(x, m):
    return (x + m - 1) // m * m


# ----------------------------------------------------------------------------
# Pallas kernel: fused 4-layer MLP (Linear->ReLU x3, Linear->Sigmoid)
# One grid step processes a (TB, LATENT_DIM) tile of latents.
# ----------------------------------------------------------------------------
def dgd_mlp_kernel(z_ref,
                   w1_ref, b1_ref,
                   w2_ref, b2_ref,
                   w3_ref, b3_ref,
                   w4_ref, b4_ref,
                   probs_ref):
    # bf16 operands into the MXU, f32 accumulation; bias add / ReLU / sigmoid in f32 (VPU/EUP).
    h = jnp.dot(z_ref[...], w1_ref[...], preferred_element_type=jnp.float32) + b1_ref[...]
    h = jnp.maximum(h, 0.0)
    h = jnp.dot(h.astype(jnp.bfloat16), w2_ref[...],
                preferred_element_type=jnp.float32) + b2_ref[...]
    h = jnp.maximum(h, 0.0)
    h = jnp.dot(h.astype(jnp.bfloat16), w3_ref[...],
                preferred_element_type=jnp.float32) + b3_ref[...]
    h = jnp.maximum(h, 0.0)
    h = jnp.dot(h.astype(jnp.bfloat16), w4_ref[...],
                preferred_element_type=jnp.float32) + b4_ref[...]
    probs_ref[...] = jax.nn.sigmoid(h)


# ----------------------------------------------------------------------------
# Wrapper: batch-tiled pallas_call with VMEM-resident weights
# ----------------------------------------------------------------------------
@jax.jit
def dgd_mlp_pallas(zs, w1, b1, w2, b2, w3, b3, w4, b4):
    """(B, LATENT_DIM) latents -> (B, 784) Bernoulli probabilities (f32)."""
    B = zs.shape[0]
    # Batch tile: multiple of 8 sublanes, capped so per-tile activations stay a few MiB.
    TB = min(512, _round_up(max(B, 1), 8))
    B_pad = _round_up(B, TB)
    grid = (B_pad // TB,)

    # Cast matmul operands to bf16 (halves weight DMA bytes); keep biases f32.
    zs_b = zs.astype(jnp.bfloat16)
    if B_pad != B:
        zs_b = jnp.zeros((B_pad, LATENT_DIM), jnp.bfloat16).at[:B].set(zs_b)
    w1b = w1.astype(jnp.bfloat16)
    w2b = w2.astype(jnp.bfloat16)
    w3b = w3.astype(jnp.bfloat16)
    # Pad the final layer to a lane-dense 896-column output; padded columns are zero.
    w4b = jnp.zeros((H3, OUT_PAD), jnp.bfloat16).at[:, :OUT_DIM].set(w4.astype(jnp.bfloat16))
    b4p = jnp.zeros((1, OUT_PAD), jnp.float32).at[:, :OUT_DIM].set(b4.astype(jnp.float32))

    def _const(shape):
        # Whole-array block, same block index every grid step -> stays resident in VMEM.
        return pl.BlockSpec(shape, lambda i: tuple(0 for _ in shape))

    flops_per_row = 2 * (LATENT_DIM * H1 + H1 * H2 + H2 * H3 + H3 * OUT_PAD)
    weight_bytes = 2 * (LATENT_DIM * H1 + H1 * H2 + H2 * H3 + H3 * OUT_PAD)  # bf16
    cost = pl.CostEstimate(
        flops=B_pad * flops_per_row,
        transcendentals=B_pad * OUT_PAD,
        bytes_accessed=weight_bytes + B_pad * LATENT_DIM * 2 + B_pad * OUT_PAD * 4,
    )

    out_pad = pl.pallas_call(
        dgd_mlp_kernel,
        out_shape=jax.ShapeDtypeStruct((B_pad, OUT_PAD), jnp.float32),
        grid=grid,
        in_specs=[
            pl.BlockSpec((TB, LATENT_DIM), lambda i: (i, 0)),   # zs tile (pipelined)
            _const((LATENT_DIM, H1)), _const((1, H1)),
            _const((H1, H2)),         _const((1, H2)),
            _const((H2, H3)),         _const((1, H3)),
            _const((H3, OUT_PAD)),    _const((1, OUT_PAD)),
        ],
        out_specs=pl.BlockSpec((TB, OUT_PAD), lambda i: (i, 0)),
        compiler_params=pltpu.CompilerParams(
            dimension_semantics=("parallel",),   # shards batch tiles across v7x's 2 TCs
            vmem_limit_bytes=32 << 20,
        ),
        cost_estimate=cost,
    )(zs_b, w1b, b1.astype(jnp.float32), w2b, b2.astype(jnp.float32),
      w3b, b3.astype(jnp.float32), w4b, b4p)

    return out_pad[:B, :OUT_DIM]


# ----------------------------------------------------------------------------
# Parameter construction (deterministic, PyTorch-like shapes)
# ----------------------------------------------------------------------------
def init_params(key, train_size, test_size, latent_dim=LATENT_DIM):
    ks = jax.random.split(key, 10)
    dims = [(latent_dim, H1), (H1, H2), (H2, H3), (H3, OUT_DIM)]
    params = {}
    for i, (fan_in, fan_out) in enumerate(dims, start=1):
        bound = 1.0 / jnp.sqrt(jnp.float32(fan_in))
        params[f"w{i}"] = jax.random.uniform(
            ks[2 * (i - 1)], (fan_in, fan_out), jnp.float32, -bound, bound)
        params[f"b{i}"] = jax.random.uniform(
            ks[2 * (i - 1) + 1], (1, fan_out), jnp.float32, -bound, bound)
    # zs_train / zs_test ~ Normal(0, 1), same as torch.normal(0, 1, ...)
    params["zs_train"] = jax.random.normal(ks[8], (train_size, latent_dim), jnp.float32)
    params["zs_test"] = jax.random.normal(ks[9], (test_size, latent_dim), jnp.float32)
    # prior_params buffer: zeros(1, 2 * latent_dim)
    params["prior_params"] = jnp.zeros((1, 2 * latent_dim), jnp.float32)
    return params


def dgd_forward(params, x, idx, mode):
    """Mirrors DGD.forward: returns (PxGz probs, (Pz mu, Pz sigma))."""
    batch = x.shape[0]
    # prior(batch): expand prior_params, chunk into mu / log_sigma, sigma = exp(log_sigma)
    pp = jnp.broadcast_to(params["prior_params"], (batch, params["prior_params"].shape[-1]))
    mu, log_sigma = jnp.split(pp, 2, axis=-1)
    sigma = jnp.exp(log_sigma)

    zs_table = params["zs_train"] if mode == "train" else params["zs_test"]
    # TODO(synk): the row gather of learned latents stays in JAX (tiny, off the hot path);
    # fusing it via scalar-prefetch + pl.Element would force a 1-row batch tile.
    zs = jnp.take(zs_table, idx, axis=0)

    probs = dgd_mlp_pallas(
        zs,
        params["w1"], params["b1"],
        params["w2"], params["b2"],
        params["w3"], params["b3"],
        params["w4"], params["b4"],
    )
    # PxGz = Bernoulli(probs=probs); Pz = Normal(mu, sigma)
    return probs, (mu, sigma)


# ----------------------------------------------------------------------------
# Main
# ----------------------------------------------------------------------------
if __name__ == "__main__":
    key = jax.random.PRNGKey(0)
    k_par, k_x = jax.random.split(key)

    train_size, test_size = 64, 16
    batch = 8

    params = init_params(k_par, train_size, test_size)

    # x only contributes its batch size to forward(); make it MNIST-flat shaped.
    x = (jax.random.uniform(k_x, (batch, OUT_DIM)) > 0.5).astype(jnp.float32)
    idx = jnp.arange(batch, dtype=jnp.int32)

    probs, (mu, sigma) = dgd_forward(params, x, idx, mode="train")
    probs = jax.block_until_ready(probs)

    # Reference check against plain-JAX f32 MLP (kernel runs bf16 matmuls, f32 accum,
    # outputs are sigmoid-squashed probabilities -> loose tolerance).
    zs = params["zs_train"][idx]
    h = jnp.maximum(zs @ params["w1"] + params["b1"], 0.0)
    h = jnp.maximum(h @ params["w2"] + params["b2"], 0.0)
    h = jnp.maximum(h @ params["w3"] + params["b3"], 0.0)
    ref = jax.nn.sigmoid(h @ params["w4"] + params["b4"])

    assert probs.shape == (batch, OUT_DIM)
    assert mu.shape == (batch, LATENT_DIM) and sigma.shape == (batch, LATENT_DIM)
    assert jnp.allclose(probs, ref, atol=2e-2, rtol=0.0), float(jnp.max(jnp.abs(probs - ref)))
    assert jnp.all((probs >= 0.0) & (probs <= 1.0))
    assert jnp.all(sigma == 1.0) and jnp.all(mu == 0.0)

    print("KERNEL_OK")
</pallas_src>

<mosaic_0001>
module attributes {stable_mosaic.version = 11 : i64} {
  func.func @dgd_mlp_kernel(%arg0: i32, %arg1: memref<8x32xbf16, #tpu.memory_space<vmem>>, %arg2: memref<32x128xbf16, #tpu.memory_space<vmem>>, %arg3: memref<1x128xf32, #tpu.memory_space<vmem>>, %arg4: memref<128x256xbf16, #tpu.memory_space<vmem>>, %arg5: memref<1x256xf32, #tpu.memory_space<vmem>>, %arg6: memref<256x512xbf16, #tpu.memory_space<vmem>>, %arg7: memref<1x512xf32, #tpu.memory_space<vmem>>, %arg8: memref<512x896xbf16, #tpu.memory_space<vmem>>, %arg9: memref<1x896xf32, #tpu.memory_space<vmem>>, %arg10: memref<8x896xf32, #tpu.memory_space<vmem>>) attributes {dimension_semantics = [#tpu.dimension_semantics<parallel>], iteration_bounds = array<i64: 1>, scalar_prefetch = 0 : i64, scratch_operands = 0 : i64, tpu.core_type = #tpu.core_type<tc>, window_params = [{transform_indices = @transform_0, window_bounds = array<i64: 8, 32>}, {pipeline_mode = #tpu.pipeline_mode<synchronous>, transform_indices = @transform_1, window_bounds = array<i64: 32, 128>}, {pipeline_mode = #tpu.pipeline_mode<synchronous>, transform_indices = @transform_2, window_bounds = array<i64: 1, 128>}, {pipeline_mode = #tpu.pipeline_mode<synchronous>, transform_indices = @transform_3, window_bounds = array<i64: 128, 256>}, {pipeline_mode = #tpu.pipeline_mode<synchronous>, transform_indices = @transform_4, window_bounds = array<i64: 1, 256>}, {pipeline_mode = #tpu.pipeline_mode<synchronous>, transform_indices = @transform_5, window_bounds = array<i64: 256, 512>}, {pipeline_mode = #tpu.pipeline_mode<synchronous>, transform_indices = @transform_6, window_bounds = array<i64: 1, 512>}, {pipeline_mode = #tpu.pipeline_mode<synchronous>, transform_indices = @transform_7, window_bounds = array<i64: 512, 896>}, {pipeline_mode = #tpu.pipeline_mode<synchronous>, transform_indices = @transform_8, window_bounds = array<i64: 1, 896>}, {transform_indices = @transform_9, window_bounds = array<i64: 8, 896>}]} {
    %c0 = arith.constant 0 : index
    %c0_0 = arith.constant 0 : index
    %0 = vector.load %arg1[%c0, %c0_0] : memref<8x32xbf16, #tpu.memory_space<vmem>>, vector<8x32xbf16>
    %c0_1 = arith.constant 0 : index
    %c0_2 = arith.constant 0 : index
    %1 = vector.load %arg2[%c0_1, %c0_2] : memref<32x128xbf16, #tpu.memory_space<vmem>>, vector<32x128xbf16>
    %cst = arith.constant dense<0.000000e+00> : vector<8x128xf32>
    %2 = tpu.matmul %0, %1, %cst {dimension_numbers = #tpu.dot_dimension_numbers<[1], [0], [0], [1], [0, 0, 1, 1], [], []>} : vector<8x32xbf16>, vector<32x128xbf16>, vector<8x128xf32> -> vector<8x128xf32>
    %c0_3 = arith.constant 0 : index
    %c0_4 = arith.constant 0 : index
    %3 = vector.load %arg3[%c0_3, %c0_4] : memref<1x128xf32, #tpu.memory_space<vmem>>, vector<1x128xf32>
    %4 = vector.broadcast %3 : vector<1x128xf32> to vector<8x128xf32>
    %5 = arith.addf %2, %4 : vector<8x128xf32>
    %cst_5 = arith.constant 0.000000e+00 : f32
    %6 = vector.broadcast %cst_5 : f32 to vector<8x128xf32>
    %7 = arith.maximumf %5, %6 : vector<8x128xf32>
    %8 = arith.truncf %7 : vector<8x128xf32> to vector<8x128xbf16>
    %c0_6 = arith.constant 0 : index
    %c0_7 = arith.constant 0 : index
    %9 = vector.load %arg4[%c0_6, %c0_7] : memref<128x256xbf16, #tpu.memory_space<vmem>>, vector<128x256xbf16>
    %cst_8 = arith.constant dense<0.000000e+00> : vector<8x256xf32>
    %10 = tpu.matmul %8, %9, %cst_8 {dimension_numbers = #tpu.dot_dimension_numbers<[1], [0], [0], [1], [0, 0, 1, 1], [], []>} : vector<8x128xbf16>, vector<128x256xbf16>, vector<8x256xf32> -> vector<8x256xf32>
    %c0_9 = arith.constant 0 : index
    %c0_10 = arith.constant 0 : index
    %11 = vector.load %arg5[%c0_9, %c0_10] : memref<1x256xf32, #tpu.memory_space<vmem>>, vector<1x256xf32>
    %12 = vector.broadcast %11 : vector<1x256xf32> to vector<8x256xf32>
    %13 = arith.addf %10, %12 : vector<8x256xf32>
    %cst_11 = arith.constant 0.000000e+00 : f32
    %14 = vector.broadcast %cst_11 : f32 to vector<8x256xf32>
    %15 = arith.maximumf %13, %14 : vector<8x256xf32>
    %16 = arith.truncf %15 : vector<8x256xf32> to vector<8x256xbf16>
    %c0_12 = arith.constant 0 : index
    %c0_13 = arith.constant 0 : index
    %17 = vector.load %arg6[%c0_12, %c0_13] : memref<256x512xbf16, #tpu.memory_space<vmem>>, vector<256x512xbf16>
    %cst_14 = arith.constant dense<0.000000e+00> : vector<8x512xf32>
    %18 = tpu.matmul %16, %17, %cst_14 {dimension_numbers = #tpu.dot_dimension_numbers<[1], [0], [0], [1], [0, 0, 1, 1], [], []>} : vector<8x256xbf16>, vector<256x512xbf16>, vector<8x512xf32> -> vector<8x512xf32>
    %c0_15 = arith.constant 0 : index
    %c0_16 = arith.constant 0 : index
    %19 = vector.load %arg7[%c0_15, %c0_16] : memref<1x512xf32, #tpu.memory_space<vmem>>, vector<1x512xf32>
    %20 = vector.broadcast %19 : vector<1x512xf32> to vector<8x512xf32>
    %21 = arith.addf %18, %20 : vector<8x512xf32>
    %cst_17 = arith.constant 0.000000e+00 : f32
    %22 = vector.broadcast %cst_17 : f32 to vector<8x512xf32>
    %23 = arith.maximumf %21, %22 : vector<8x512xf32>
    %24 = arith.truncf %23 : vector<8x512xf32> to vector<8x512xbf16>
    %c0_18 = arith.constant 0 : index
    %c0_19 = arith.constant 0 : index
    %25 = vector.load %arg8[%c0_18, %c0_19] : memref<512x896xbf16, #tpu.memory_space<vmem>>, vector<512x896xbf16>
    %cst_20 = arith.constant dense<0.000000e+00> : vector<8x896xf32>
    %26 = tpu.matmul %24, %25, %cst_20 {dimension_numbers = #tpu.dot_dimension_numbers<[1], [0], [0], [1], [0, 0, 1, 1], [], []>} : vector<8x512xbf16>, vector<512x896xbf16>, vector<8x896xf32> -> vector<8x896xf32>
    %c0_21 = arith.constant 0 : index
    %c0_22 = arith.constant 0 : index
    %27 = vector.load %arg9[%c0_21, %c0_22] : memref<1x896xf32, #tpu.memory_space<vmem>>, vector<1x896xf32>
    %28 = vector.broadcast %27 : vector<1x896xf32> to vector<8x896xf32>
    %29 = arith.addf %26, %28 : vector<8x896xf32>
    %30 = arith.negf %29 : vector<8x896xf32>
    %31 = math.exp %30 : vector<8x896xf32>
    %cst_23 = arith.constant 1.000000e+00 : f32
    %32 = vector.broadcast %cst_23 : f32 to vector<8x896xf32>
    %33 = arith.addf %32, %31 : vector<8x896xf32>
    %34 = arith.divf %32, %33 : vector<8x896xf32>
    %c0_24 = arith.constant 0 : index
    %c0_25 = arith.constant 0 : index
    %35 = vector.load %arg10[%c0_24, %c0_25] : memref<8x896xf32, #tpu.memory_space<vmem>>, vector<8x896xf32>
    tpu.vector_store %arg10[%c0_24, %c0_25], %34 {strides = array<i32>} : memref<8x896xf32, #tpu.memory_space<vmem>>, vector<8x896xf32>,
    return
  }
  func.func @transform_0(%arg0: i32) -> (i32, i32) {
    %c0_i32 = arith.constant 0 : i32
    %c0_i32_0 = arith.constant 0 : i32
    return %arg0, %c0_i32 : i32, i32
  }
  func.func @transform_1(%arg0: i32) -> (i32, i32) {
    %c0_i32 = arith.constant 0 : i32
    %c0_i32_0 = arith.constant 0 : i32
    %c0_i32_1 = arith.constant 0 : i32
    return %c0_i32, %c0_i32_0 : i32, i32
  }
  func.func @transform_2(%arg0: i32) -> (i32, i32) {
    %c0_i32 = arith.constant 0 : i32
    %c0_i32_0 = arith.constant 0 : i32
    %c0_i32_1 = arith.constant 0 : i32
    return %c0_i32, %c0_i32_0 : i32, i32
  }
  func.func @transform_3(%arg0: i32) -> (i32, i32) {
    %c0_i32 = arith.constant 0 : i32
    %c0_i32_0 = arith.constant 0 : i32
    %c0_i32_1 = arith.constant 0 : i32
    return %c0_i32, %c0_i32_0 : i32, i32
  }
  func.func @transform_4(%arg0: i32) -> (i32, i32) {
    %c0_i32 = arith.constant 0 : i32
    %c0_i32_0 = arith.constant 0 : i32
    %c0_i32_1 = arith.constant 0 : i32
    return %c0_i32, %c0_i32_0 : i32, i32
  }
  func.func @transform_5(%arg0: i32) -> (i32, i32) {
    %c0_i32 = arith.constant 0 : i32
    %c0_i32_0 = arith.constant 0 : i32
    %c0_i32_1 = arith.constant 0 : i32
    return %c0_i32, %c0_i32_0 : i32, i32
  }
  func.func @transform_6(%arg0: i32) -> (i32, i32) {
    %c0_i32 = arith.constant 0 : i32
    %c0_i32_0 = arith.constant 0 : i32
    %c0_i32_1 = arith.constant 0 : i32
    return %c0_i32, %c0_i32_0 : i32, i32
  }
  func.func @transform_7(%arg0: i32) -> (i32, i32) {
    %c0_i32 = arith.constant 0 : i32
    %c0_i32_0 = arith.constant 0 : i32
    %c0_i32_1 = arith.constant 0 : i32
    return %c0_i32, %c0_i32_0 : i32, i32
  }
  func.func @transform_8(%arg0: i32) -> (i32, i32) {
    %c0_i32 = arith.constant 0 : i32
    %c0_i32_0 = arith.constant 0 : i32
    %c0_i32_1 = arith.constant 0 : i32
    return %c0_i32, %c0_i32_0 : i32, i32
  }
  func.func @transform_9(%arg0: i32) -> (i32, i32) {
    %c0_i32 = arith.constant 0 : i32
    %c0_i32_0 = arith.constant 0 : i32
    return %arg0, %c0_i32 : i32, i32
  }
}

</mosaic_0001>

<bundles_post_ra>
// kernel: dgd_mlp_pallas.1
= control target key start
LH: loop header
LB: loop body
LE: loop exit
PB: predicated region body
PF: predicated region fallthrough
CT: control target
= control target key end

     0   :  { %v3473_v1 = vmov 0.0   ;;  %vm3474_vm0 = vmmov 0   ;;  %vm58_vm1 = vcmask 261120   ;;  %v3475_v20 = vmov 0   ;;  %s4541_s0 = inlined_call_operand.vmem [shape: bf16[8,32], index: 0, kind: input, shape index: {}]   ;;  %s4542_s1 = inlined_call_operand.vmem [shape: bf16[32,128], index: 1, kind: input, shape index: {}]   ;;  %s4543_s2 = inlined_call_operand.vmem [shape: f32[1,128], index: 2, kind: input, shape index: {}]   ;;  %s4544_s3 = inlined_call_operand.vmem [shape: bf16[128,256], index: 3, kind: input, shape index: {}]   ;;  %s4545_s4 = inlined_call_operand.vmem [shape: f32[1,256], index: 4, kind: input, shape index: {}]   ;;  %s4546_s5 = inlined_call_operand.vmem [shape: bf16[256,512], index: 5, kind: input, shape index: {}]   ;;  %s4547_s6 = inlined_call_operand.vmem [shape: f32[1,512], index: 6, kind: input, shape index: {}]   ;;  %s4548_s7 = inlined_call_operand.vmem [shape: bf16[512,896], index: 7, kind: input, shape index: {}]   ;;  %s4549_s8 = inlined_call_operand.vmem [shape: f32[1,896], index: 8, kind: input, shape index: {}]   ;;  %s4550_s9 = inlined_call_operand.hbm [shape: f32[8,896], index: 9, kind: output, shape index: {}]  }
   0x1   :  { %v2979_v0 = vld [vmem:[%s4542_s1] sm:$0xff]   ;;  %2949 = vmatprep.subr.bf16.mxu1 %v3473_v1  ;;  %v2980_v2 = vld [vmem:[%s4542_s1 + $0x8] sm:$0xff]   ;;  %2953 = vmatprep.mubr.msk.bf16.mxu1 %vm3474_vm0, %v3473_v1  ;;  %v2986_v6 = vld [vmem:[%s4544_s3 + $0x14] ss:$8 sps:$4 sm:$0xff]  }
   0x2   :  { %2950 = vmatpush3.bf16.msra.mxu1 %v2979_v0  ;;  %v2983_v3 = vld [vmem:[%s4544_s3 + $0x4] ss:$8 sps:$4 sm:$0xff]   ;;  %v34_v4 = vld [vmem:[%s4541_s0] sm:$0xf]  ;;  %v2984_v7 = vld [vmem:[%s4544_s3 + $0x10] ss:$8 sps:$4 sm:$0xff]  }
   0x3   :  { %2951 = vmatprep.subr.bf16.mxu1 %v3473_v1  ;;  %v2981_v5 = vld [vmem:[%s4544_s3] ss:$8 sps:$4 sm:$0xff]   ;;  %v2989_v8 = vld [vmem:[%s4544_s3 + $0x24] ss:$8 sps:$4 sm:$0xff]   ;;  %v2992_v10 = vld [vmem:[%s4544_s3 + $0x34] ss:$8 sps:$4 sm:$0xff]  }
   0x4   :  { %v2987_v9 = vld [vmem:[%s4544_s3 + $0x20] ss:$8 sps:$4 sm:$0xff]   ;;  %v2990_v11 = vld [vmem:[%s4544_s3 + $0x30] ss:$8 sps:$4 sm:$0xff]   ;;  %v2995_v12 = vld [vmem:[%s4544_s3 + $0x44] ss:$8 sps:$4 sm:$0xff]  }
   0x5   :  { %v2993_v13 = vld [vmem:[%s4544_s3 + $0x40] ss:$8 sps:$4 sm:$0xff]   ;;  %v2998_v14 = vld [vmem:[%s4544_s3 + $0x54] ss:$8 sps:$4 sm:$0xff]   ;;  %v2996_v15 = vld [vmem:[%s4544_s3 + $0x50] ss:$8 sps:$4 sm:$0xff]  }
   0x6   :  { %2952 = vmatpush3.bf16.msra.mxu1 %v2980_v2  ;;  %v3001_v16 = vld [vmem:[%s4544_s3 + $0x64] ss:$8 sps:$4 sm:$0xff]   ;;  %v2999_v17 = vld [vmem:[%s4544_s3 + $0x60] ss:$8 sps:$4 sm:$0xff]   ;;  %v3004_v18 = vld [vmem:[%s4544_s3 + $0x74] ss:$8 sps:$4 sm:$0xff]  }
   0x7   :  { %212 = vmatprep.subr.bf16.mxu1 %v2983_v3  ;;  %v3002_v19 = vld [vmem:[%s4544_s3 + $0x70] ss:$8 sps:$4 sm:$0xff]   ;;  %v3005_v21 = vld [vmem:[%s4546_s5 + $0x4] ss:$16 sps:$4 sm:$0xff]   ;;  %v3009_v22 = vld [vmem:[%s4546_s5 + $0xc] ss:$16 sps:$4 sm:$0xff]  }
   0x8   :  { %v3010_v23 = vld [vmem:[%s4546_s5] ss:$16 sps:$4 sm:$0xff]   ;;  %v3011_v24 = vld [vmem:[%s4546_s5 + $0x24] ss:$16 sps:$4 sm:$0xff]   ;;  %663 = vmatprep.subr.bf16.mxu0 %v3005_v21 }
   0x9   :  { %2954 = vmatmul.mubr.msk.bf16.vlgmr.msra.gmra.mrb[0].mxu1 %vm58_vm1, %v34_v4  ;;  %v3016_v25 = vld [vmem:[%s4546_s5 + $0x20] ss:$16 sps:$4 sm:$0xff]   ;;  %664 = vmatpush1.bf16.msra.mxu0 %v3010_v23  ;;  %v3017_v26 = vld [vmem:[%s4546_s5 + $0x44] ss:$16 sps:$4 sm:$0xff]  }
   0xa   :  { %213 = vmatpush1.bf16.msra.mxu1 %v2981_v5  ;;  %244 = vmatprep.mubr.bf16.mxu1 %v3475_v20  ;;  %v3022_v27 = vld [vmem:[%s4546_s5 + $0x40] ss:$16 sps:$4 sm:$0xff]   ;;  %v3023_v28 = vld [vmem:[%s4546_s5 + $0x64] ss:$16 sps:$4 sm:$0xff]  }
   0xb   :  { %214 = vmatprep.subr.bf16.mxu1 %v2986_v6  ;;  %665 = vmatprep.subr.bf16.mxu0 %v3011_v24  ;;  %v3028_v29 = vld [vmem:[%s4546_s5 + $0x60] ss:$16 sps:$4 sm:$0xff]   ;;  %v3029_v30 = vld [vmem:[%s4546_s5 + $0x84] ss:$16 sps:$4 sm:$0xff]  }
   0xc   :  { %v3034_v31 = vld [vmem:[%s4546_s5 + $0x80] ss:$16 sps:$4 sm:$0xff]   ;;  %v3035_v32 = vld [vmem:[%s4546_s5 + $0xa4] ss:$16 sps:$4 sm:$0xff]  }
   0xd   :  { %666 = vmatpush1.bf16.msra.mxu0 %v3016_v25  ;;  %v3040_v33 = vld [vmem:[%s4546_s5 + $0xa0] ss:$16 sps:$4 sm:$0xff]   ;;  %v3041_v34 = vld [vmem:[%s4546_s5 + $0xc4] ss:$16 sps:$4 sm:$0xff]  }
   0xe   :  { %215 = vmatpush1.bf16.msra.mxu1 %v2984_v7  ;;  %667 = vmatprep.subr.bf16.mxu0 %v3017_v26  ;;  %v3046_v35 = vld [vmem:[%s4546_s5 + $0xc0] ss:$16 sps:$4 sm:$0xff]   ;;  %v3047_v36 = vld [vmem:[%s4546_s5 + $0xe4] ss:$16 sps:$4 sm:$0xff]  }
   0xf   :  { %216 = vmatprep.subr.bf16.mxu1 %v2989_v8  ;;  %v3052_v37 = vld [vmem:[%s4546_s5 + $0xe0] ss:$16 sps:$4 sm:$0xff]   ;;  %v3053_v38 = vld [vmem:[%s4546_s5 + $0x104] ss:$16 sps:$4 sm:$0xff]  }
  0x10   :  { %v3058_v39 = vld [vmem:[%s4546_s5 + $0x100] ss:$16 sps:$4 sm:$0xff]   ;;  %v3059_v40 = vld [vmem:[%s4546_s5 + $0x124] ss:$16 sps:$4 sm:$0xff]  }
  0x11   :  { %668 = vmatpush1.bf16.msra.mxu0 %v3022_v27 }
  0x12   :  { %217 = vmatpush1.bf16.msra.mxu1 %v2987_v9  ;;  %669 = vmatprep.subr.bf16.mxu0 %v3023_v28 }
  0x13   :  { %218 = vmatprep.subr.bf16.mxu1 %v2992_v10 }
  0x15   :  { %670 = vmatpush1.bf16.msra.mxu0 %v3028_v29 }
  0x16   :  { %219 = vmatpush1.bf16.msra.mxu1 %v2990_v11  ;;  %671 = vmatprep.subr.bf16.mxu0 %v3029_v30 }
  0x17   :  { %220 = vmatprep.subr.bf16.mxu1 %v2995_v12 }
  0x19   :  { %672 = vmatpush1.bf16.msra.mxu0 %v3034_v31 }
  0x1a   :  { %221 = vmatpush1.bf16.msra.mxu1 %v2993_v13  ;;  %673 = vmatprep.subr.bf16.mxu0 %v3035_v32 }
  0x1b   :  { %222 = vmatprep.subr.bf16.mxu1 %v2998_v14 }
  0x1d   :  { %674 = vmatpush1.bf16.msra.mxu0 %v3040_v33 }
  0x1e   :  { %223 = vmatpush1.bf16.msra.mxu1 %v2996_v15  ;;  %675 = vmatprep.subr.bf16.mxu0 %v3041_v34 }
  0x1f   :  { %224 = vmatprep.subr.bf16.mxu1 %v3001_v16 }
  0x21   :  { %676 = vmatpush1.bf16.msra.mxu0 %v3046_v35 }
  0x22   :  { %225 = vmatpush1.bf16.msra.mxu1 %v2999_v17  ;;  %677 = vmatprep.subr.bf16.mxu0 %v3047_v36 }
  0x23   :  { %226 = vmatprep.subr.bf16.mxu1 %v3004_v18 }
  0x25   :  { %678 = vmatpush1.bf16.msra.mxu0 %v3052_v37 }
  0x26   :  { %227 = vmatpush1.bf16.msra.mxu1 %v3002_v19  ;;  %679 = vmatprep.subr.bf16.mxu0 %v3053_v38 }
  0x27   :  { %704 = vmatprep.subr.bf16.mxu1 %v3009_v22 }
  0x28   :  { %14 = vsyncpa [#allocation3], 0  ;;  %v3064_v41 = vld [vmem:[%s4546_s5 + $0x120] ss:$16 sps:$4 sm:$0xff]   ;;  %v3065_v42 = vld [vmem:[%s4546_s5 + $0x144] ss:$16 sps:$4 sm:$0xff]   ;;  %v122_v31 = vlaneseq }
  0x29   :  { %680 = vmatpush1.bf16.msra.mxu0 %v3058_v39  ;;  %v3070_v43 = vld [vmem:[%s4546_s5 + $0x140] ss:$16 sps:$4 sm:$0xff]   ;;  %v3071_v44 = vld [vmem:[%s4546_s5 + $0x164] ss:$16 sps:$4 sm:$0xff]   ;;  %v3007_v57 = vld [vmem:[%s4546_s5 + $0x8] ss:$16 sps:$4 sm:$0xff]  }
  0x2a   :  { %681 = vmatprep.subr.bf16.mxu0 %v3059_v40  ;;  %v3076_v45 = vld [vmem:[%s4546_s5 + $0x160] ss:$16 sps:$4 sm:$0xff]   ;;  %v3077_v46 = vld [vmem:[%s4546_s5 + $0x184] ss:$16 sps:$4 sm:$0xff]   ;;  %v3015_v59 = vld [vmem:[%s4546_s5 + $0x2c] ss:$16 sps:$4 sm:$0xff]  }
  0x2b   :  { %v3082_v47 = vld [vmem:[%s4546_s5 + $0x180] ss:$16 sps:$4 sm:$0xff]   ;;  %v3083_v48 = vld [vmem:[%s4546_s5 + $0x1a4] ss:$16 sps:$4 sm:$0xff]   ;;  %v3013_v60 = vld [vmem:[%s4546_s5 + $0x28] ss:$16 sps:$4 sm:$0xff]  }
  0x2c   :  { %v3088_v49 = vld [vmem:[%s4546_s5 + $0x1a0] ss:$16 sps:$4 sm:$0xff]   ;;  %v3021_v61 = vld [vmem:[%s4546_s5 + $0x4c] ss:$16 sps:$4 sm:$0xff]   ;;  %v3019_v62 = vld [vmem:[%s4546_s5 + $0x48] ss:$16 sps:$4 sm:$0xff]  }
  0x2d   :  { %682 = vmatpush1.bf16.msra.mxu0 %v3064_v41  ;;  %v2587_v50 = vld [vmem:[%s4543_s2] ss:$0 sm:$0xff]  ;;  %v3027_v63 = vld [vmem:[%s4546_s5 + $0x6c] ss:$16 sps:$4 sm:$0xff]   ;;  %v3025_v0 = vld [vmem:[%s4546_s5 + $0x68] ss:$16 sps:$4 sm:$0xff]  }
  0x2e   :  { %683 = vmatprep.subr.bf16.mxu0 %v3065_v42  ;;  %v3033_v1 = vld [vmem:[%s4546_s5 + $0x8c] ss:$16 sps:$4 sm:$0xff]   ;;  %v3031_v2 = vld [vmem:[%s4546_s5 + $0x88] ss:$16 sps:$4 sm:$0xff]   ;;  %v3089_v21 = vld [vmem:[%s4546_s5 + $0x1c4] ss:$16 sps:$4 sm:$0xff]  }
  0x2f   :  { %v3039_v3 = vld [vmem:[%s4546_s5 + $0xac] ss:$16 sps:$4 sm:$0xff]   ;;  %v3037_v4 = vld [vmem:[%s4546_s5 + $0xa8] ss:$16 sps:$4 sm:$0xff]   ;;  %v3094_v24 = vld [vmem:[%s4546_s5 + $0x1c0] ss:$16 sps:$4 sm:$0xff]  }
  0x30   :  { %v3045_v5 = vld [vmem:[%s4546_s5 + $0xcc] ss:$16 sps:$4 sm:$0xff]   ;;  %v3043_v6 = vld [vmem:[%s4546_s5 + $0xc8] ss:$16 sps:$4 sm:$0xff]   ;;  %v3095_v25 = vld [vmem:[%s4546_s5 + $0x1e4] ss:$16 sps:$4 sm:$0xff]  }
  0x31   :  { %684 = vmatpush1.bf16.msra.mxu0 %v3070_v43  ;;  %v3051_v7 = vld [vmem:[%s4546_s5 + $0xec] ss:$16 sps:$4 sm:$0xff]   ;;  %v3049_v8 = vld [vmem:[%s4546_s5 + $0xe8] ss:$16 sps:$4 sm:$0xff]   ;;  %v3100_v28 = vld [vmem:[%s4546_s5 + $0x1e0] ss:$16 sps:$4 sm:$0xff]  }
  0x32   :  { %685 = vmatprep.subr.bf16.mxu0 %v3071_v44  ;;  %v3057_v9 = vld [vmem:[%s4546_s5 + $0x10c] ss:$16 sps:$4 sm:$0xff]   ;;  %v3055_v10 = vld [vmem:[%s4546_s5 + $0x108] ss:$16 sps:$4 sm:$0xff]   ;;  %v3103_v29 = vld [vmem:[%s4548_s7 + $0x4] ss:$28 sps:$4 sm:$0xff]  }
  0x33   :  { %v3063_v11 = vld [vmem:[%s4546_s5 + $0x12c] ss:$16 sps:$4 sm:$0xff]   ;;  %v3061_v12 = vld [vmem:[%s4546_s5 + $0x128] ss:$16 sps:$4 sm:$0xff]   ;;  %v3785_v32 = vshrl.u32 %v122_v31, 7 }
  0x34   :  { %v3069_v13 = vld [vmem:[%s4546_s5 + $0x14c] ss:$16 sps:$4 sm:$0xff]   ;;  %v3067_v14 = vld [vmem:[%s4546_s5 + $0x148] ss:$16 sps:$4 sm:$0xff]   ;;  %v120_v34 = vld [vmem:[%s4545_s4] sm:$0x3] }
  0x35   :  { %686 = vmatpush1.bf16.msra.mxu0 %v3076_v45  ;;  %v3075_v15 = vld [vmem:[%s4546_s5 + $0x16c] ss:$16 sps:$4 sm:$0xff]   ;;  %v3073_v16 = vld [vmem:[%s4546_s5 + $0x168] ss:$16 sps:$4 sm:$0xff]   ;;  %v3788_v33 = vsub.s32 0, %v3785_v32  ;;  %v3794_v35 = vsub.s32 1, %v3785_v32 }
  0x36   :  { %687 = vmatprep.subr.bf16.mxu0 %v3077_v46  ;;  %v3081_v17 = vld [vmem:[%s4546_s5 + $0x18c] ss:$16 sps:$4 sm:$0xff]   ;;  %v3079_v18 = vld [vmem:[%s4546_s5 + $0x188] ss:$16 sps:$4 sm:$0xff]  }
  0x37   :  { %v3087_v19 = vld [vmem:[%s4546_s5 + $0x1ac] ss:$16 sps:$4 sm:$0xff]   ;;  %v3085_v20 = vld [vmem:[%s4546_s5 + $0x1a8] ss:$16 sps:$4 sm:$0xff]   ;;  %v125_v36 = vrot.slane %v120_v34, %v3788_v33  ;;  %v129_v37 = vrot.slane %v120_v34, %v3794_v35 }
  0x38   :  { %v3093_v22 = vld [vmem:[%s4546_s5 + $0x1cc] ss:$16 sps:$4 sm:$0xff]   ;;  %v3091_v23 = vld [vmem:[%s4546_s5 + $0x1c8] ss:$16 sps:$4 sm:$0xff]  }
  0x39   :  { %688 = vmatpush1.bf16.msra.mxu0 %v3082_v47  ;;  %v3099_v26 = vld [vmem:[%s4546_s5 + $0x1ec] ss:$16 sps:$4 sm:$0xff]   ;;  %v3097_v27 = vld [vmem:[%s4546_s5 + $0x1e8] ss:$16 sps:$4 sm:$0xff]  }
  0x3a   :  { %689 = vmatprep.subr.bf16.mxu0 %v3083_v48  ;;  %v3106_v30 = vld [vmem:[%s4548_s7 + $0xc] ss:$28 sps:$4 sm:$0xff]   ;;  %v3101_v47 = vld [vmem:[%s4548_s7] ss:$28 sps:$4 sm:$0xff]  }
  0x3b   :  { %v3104_v48 = vld [vmem:[%s4548_s7 + $0x8] ss:$28 sps:$4 sm:$0xff]   ;;  %v3173_v34 = vld [vmem:[%s4548_s7 + $0x2a0] ss:$28 sps:$4 sm:$0xff]  }
  0x3c   :  { %v3178_v31 = vld [vmem:[%s4548_s7 + $0x2ac] ss:$28 sps:$4 sm:$0xff]  }
  0x3d   :  { %690 = vmatpush1.bf16.msra.mxu0 %v3088_v49 }
  0x3e   :  { %691 = vmatprep.subr.bf16.mxu0 %v3089_v21  ;;  %v3158_v21 = vld [vmem:[%s4548_s7 + $0x200] ss:$28 sps:$4 sm:$0xff]  }
  0x41   :  { %692 = vmatpush1.bf16.msra.mxu0 %v3094_v24  ;;  %v3161_v24 = vld [vmem:[%s4548_s7 + $0x230] ss:$28 sps:$4 sm:$0xff]  }
  0x42   :  { %693 = vmatprep.subr.bf16.mxu0 %v3095_v25  ;;  %v3164_v25 = vld [vmem:[%s4548_s7 + $0x238] ss:$28 sps:$4 sm:$0xff]  }
  0x45   :  { %694 = vmatpush1.bf16.msra.mxu0 %v3100_v28  ;;  %v3167_v28 = vld [vmem:[%s4548_s7 + $0x268] ss:$28 sps:$4 sm:$0xff]  }
  0x46   :  { %2198 = vmatprep.subr.bf16.mxu0 %v3103_v29  ;;  %v3170_v29 = vld [vmem:[%s4548_s7 + $0x270] ss:$28 sps:$4 sm:$0xff]  }
  0xdc   :  { %v96_v51 = vpop.f32.mrb[0].mxu1 }
  0xdd   :  { %v97_v52 = vadd.f32 %v2587_v50, %v96_v51  ;;  %v2955_v53 = vpop.f32.mrb[1].mxu1  ;;  %v3109_v50 = vld [vmem:[%s4548_s7 + $0x3c] ss:$28 sps:$4 sm:$0xff]   ;;  %v3112_v51 = vld [vmem:[%s4548_s7 + $0x44] ss:$28 sps:$4 sm:$0xff]  }
  0xde   :  { %v99_v54 = vpop.f32.mrb[2].mxu1  ;;  %v3110_v53 = vld [vmem:[%s4548_s7 + $0x40] ss:$28 sps:$4 sm:$0xff]  }
  0xdf   :  { %v102_v55 = vmax.f32 %v97_v52, 0.0  ;;  %v2956_v56 = vpop.f32.mrb[3].mxu1  ;;  %v3107_v52 = vld [vmem:[%s4548_s7 + $0x38] ss:$28 sps:$4 sm:$0xff]  }
  0xe0   :  { %v3115_v54 = vld [vmem:[%s4548_s7 + $0x74] ss:$28 sps:$4 sm:$0xff]  }
  0xe1   :  { %v103_v58 = vpack.c.bf16 %v102_v55, %v102_v55  ;;  %v3118_v55 = vld [vmem:[%s4548_s7 + $0x7c] ss:$28 sps:$4 sm:$0xff]   ;;  %v3113_v56 = vld [vmem:[%s4548_s7 + $0x70] ss:$28 sps:$4 sm:$0xff]  }
  0xe3   :  { %245 = vmatmul.mubr.bf16.vlgmr.msra.gmra.mrb[4].mxu1 %v103_v58  ;;  %v3121_v58 = vld [vmem:[%s4548_s7 + $0xac] ss:$28 sps:$4 sm:$0xff]  }
  0xe4   :  { %705 = vmatpush1.bf16.msra.mxu1 %v3007_v57  ;;  %v3116_v57 = vld [vmem:[%s4548_s7 + $0x78] ss:$28 sps:$4 sm:$0xff]  }
  0xe5   :  { %706 = vmatprep.subr.bf16.mxu1 %v3015_v59  ;;  %v3124_v59 = vld [vmem:[%s4548_s7 + $0xb4] ss:$28 sps:$4 sm:$0xff]  }
  0xe8   :  { %707 = vmatpush1.bf16.msra.mxu1 %v3013_v60  ;;  %v3119_v60 = vld [vmem:[%s4548_s7 + $0xa8] ss:$28 sps:$4 sm:$0xff]  }
  0xe9   :  { %708 = vmatprep.subr.bf16.mxu1 %v3021_v61  ;;  %v3122_v61 = vld [vmem:[%s4548_s7 + $0xb0] ss:$28 sps:$4 sm:$0xff]  }
  0xec   :  { %709 = vmatpush1.bf16.msra.mxu1 %v3019_v62  ;;  %v3127_v62 = vld [vmem:[%s4548_s7 + $0xe4] ss:$28 sps:$4 sm:$0xff]  }
  0xed   :  { %710 = vmatprep.subr.bf16.mxu1 %v3027_v63  ;;  %v3130_v63 = vld [vmem:[%s4548_s7 + $0xec] ss:$28 sps:$4 sm:$0xff]  }
  0xf0   :  { %711 = vmatpush1.bf16.msra.mxu1 %v3025_v0  ;;  %v3125_v0 = vld [vmem:[%s4548_s7 + $0xe0] ss:$28 sps:$4 sm:$0xff]  }
  0xf1   :  { %712 = vmatprep.subr.bf16.mxu1 %v3033_v1  ;;  %v3128_v1 = vld [vmem:[%s4548_s7 + $0xe8] ss:$28 sps:$4 sm:$0xff]  }
  0xf4   :  { %713 = vmatpush1.bf16.msra.mxu1 %v3031_v2  ;;  %v3133_v2 = vld [vmem:[%s4548_s7 + $0x11c] ss:$28 sps:$4 sm:$0xff]  }
  0xf5   :  { %714 = vmatprep.subr.bf16.mxu1 %v3039_v3  ;;  %v3136_v3 = vld [vmem:[%s4548_s7 + $0x124] ss:$28 sps:$4 sm:$0xff]  }
  0xf8   :  { %715 = vmatpush1.bf16.msra.mxu1 %v3037_v4  ;;  %v3131_v4 = vld [vmem:[%s4548_s7 + $0x118] ss:$28 sps:$4 sm:$0xff]  }
  0xf9   :  { %716 = vmatprep.subr.bf16.mxu1 %v3045_v5  ;;  %v3134_v5 = vld [vmem:[%s4548_s7 + $0x120] ss:$28 sps:$4 sm:$0xff]  }
  0xfc   :  { %717 = vmatpush1.bf16.msra.mxu1 %v3043_v6  ;;  %v3139_v6 = vld [vmem:[%s4548_s7 + $0x154] ss:$28 sps:$4 sm:$0xff]  }
  0xfd   :  { %718 = vmatprep.subr.bf16.mxu1 %v3051_v7  ;;  %v3142_v7 = vld [vmem:[%s4548_s7 + $0x15c] ss:$28 sps:$4 sm:$0xff]  }
 0x100   :  { %719 = vmatpush1.bf16.msra.mxu1 %v3049_v8  ;;  %v3137_v8 = vld [vmem:[%s4548_s7 + $0x150] ss:$28 sps:$4 sm:$0xff]  }
 0x101   :  { %720 = vmatprep.subr.bf16.mxu1 %v3057_v9  ;;  %v3140_v9 = vld [vmem:[%s4548_s7 + $0x158] ss:$28 sps:$4 sm:$0xff]  }
 0x104   :  { %721 = vmatpush1.bf16.msra.mxu1 %v3055_v10  ;;  %v3145_v10 = vld [vmem:[%s4548_s7 + $0x18c] ss:$28 sps:$4 sm:$0xff]  }
 0x105   :  { %722 = vmatprep.subr.bf16.mxu1 %v3063_v11  ;;  %v3148_v11 = vld [vmem:[%s4548_s7 + $0x194] ss:$28 sps:$4 sm:$0xff]  }
 0x108   :  { %723 = vmatpush1.bf16.msra.mxu1 %v3061_v12  ;;  %v3143_v12 = vld [vmem:[%s4548_s7 + $0x188] ss:$28 sps:$4 sm:$0xff]  }
 0x109   :  { %724 = vmatprep.subr.bf16.mxu1 %v3069_v13  ;;  %v3146_v13 = vld [vmem:[%s4548_s7 + $0x190] ss:$28 sps:$4 sm:$0xff]  }
 0x10c   :  { %725 = vmatpush1.bf16.msra.mxu1 %v3067_v14  ;;  %v3151_v14 = vld [vmem:[%s4548_s7 + $0x1c4] ss:$28 sps:$4 sm:$0xff]  }
 0x10d   :  { %726 = vmatprep.subr.bf16.mxu1 %v3075_v15  ;;  %v3154_v15 = vld [vmem:[%s4548_s7 + $0x1cc] ss:$28 sps:$4 sm:$0xff]  }
 0x110   :  { %727 = vmatpush1.bf16.msra.mxu1 %v3073_v16  ;;  %v3149_v16 = vld [vmem:[%s4548_s7 + $0x1c0] ss:$28 sps:$4 sm:$0xff]  }
 0x111   :  { %728 = vmatprep.subr.bf16.mxu1 %v3081_v17  ;;  %v3152_v17 = vld [vmem:[%s4548_s7 + $0x1c8] ss:$28 sps:$4 sm:$0xff]  }
 0x114   :  { %729 = vmatpush1.bf16.msra.mxu1 %v3079_v18  ;;  %v3157_v18 = vld [vmem:[%s4548_s7 + $0x1fc] ss:$28 sps:$4 sm:$0xff]  }
 0x115   :  { %730 = vmatprep.subr.bf16.mxu1 %v3087_v19  ;;  %v3160_v19 = vld [vmem:[%s4548_s7 + $0x204] ss:$28 sps:$4 sm:$0xff]  }
 0x118   :  { %731 = vmatpush1.bf16.msra.mxu1 %v3085_v20  ;;  %v3155_v20 = vld [vmem:[%s4548_s7 + $0x1f8] ss:$28 sps:$4 sm:$0xff]  }
 0x119   :  { %732 = vmatprep.subr.bf16.mxu1 %v3093_v22  ;;  %v3163_v22 = vld [vmem:[%s4548_s7 + $0x234] ss:$28 sps:$4 sm:$0xff]  }
 0x11c   :  { %733 = vmatpush1.bf16.msra.mxu1 %v3091_v23  ;;  %v3166_v23 = vld [vmem:[%s4548_s7 + $0x23c] ss:$28 sps:$4 sm:$0xff]  }
 0x11d   :  { %734 = vmatprep.subr.bf16.mxu1 %v3099_v26  ;;  %v3169_v26 = vld [vmem:[%s4548_s7 + $0x26c] ss:$28 sps:$4 sm:$0xff]  }
 0x120   :  { %735 = vmatpush1.bf16.msra.mxu1 %v3097_v27  ;;  %v3172_v27 = vld [vmem:[%s4548_s7 + $0x274] ss:$28 sps:$4 sm:$0xff]  }
 0x121   :  { %2280 = vmatprep.subr.bf16.mxu1 %v3106_v30  ;;  %v3175_v30 = vld [vmem:[%s4548_s7 + $0x2a4] ss:$28 sps:$4 sm:$0xff]  }
 0x1b6   :  { %v246_v38 = vpop.f32.mrb[4].mxu1 }
 0x1b7   :  { %v247_v39 = vadd.f32 %v246_v38, %v125_v36  ;;  %v248_v40 = vpop.f32.mrb[5].mxu1  ;;  %v3176_v36 = vld [vmem:[%s4548_s7 + $0x2a8] ss:$28 sps:$4 sm:$0xff]  }
 0x1b8   :  { %v249_v41 = vadd.f32 %v248_v40, %v129_v37  ;;  %v250_v42 = vpop.f32.mrb[6].mxu1  ;;  %v3181_v37 = vld [vmem:[%s4548_s7 + $0x2dc] ss:$28 sps:$4 sm:$0xff]   ;;  %v3184_v38 = vld [vmem:[%s4548_s7 + $0x2e4] ss:$28 sps:$4 sm:$0xff]  }
 0x1b9   :  { %v253_v43 = vmax.f32 %v247_v39, 0.0  ;;  %v251_v44 = vpop.f32.mrb[7].mxu1  ;;  %v3179_v39 = vld [vmem:[%s4548_s7 + $0x2d8] ss:$28 sps:$4 sm:$0xff]   ;;  %v3182_v40 = vld [vmem:[%s4548_s7 + $0x2e0] ss:$28 sps:$4 sm:$0xff]  }
 0x1ba   :  { %v254_v45 = vmax.f32 %v249_v41, 0.0  ;;  %v3187_v41 = vld [vmem:[%s4548_s7 + $0x314] ss:$28 sps:$4 sm:$0xff]   ;;  %v3190_v42 = vld [vmem:[%s4548_s7 + $0x31c] ss:$28 sps:$4 sm:$0xff]  }
 0x1bb   :  { %v255_v49 = vpack.c.bf16 %v253_v43, %v253_v43  ;;  %v3185_v43 = vld [vmem:[%s4548_s7 + $0x310] ss:$28 sps:$4 sm:$0xff]   ;;  %v3188_v44 = vld [vmem:[%s4548_s7 + $0x318] ss:$28 sps:$4 sm:$0xff]  }
 0x1bc   :  { %v256_v46 = vpack.c.bf16 %v254_v45, %v254_v45  ;;  %v3193_v45 = vld [vmem:[%s4548_s7 + $0x34c] ss:$28 sps:$4 sm:$0xff]  }
 0x1be   :  { %695 = vmatprep.mubr.bf16.mxu0 %v256_v46  ;;  %736 = vmatprep.mubr.bf16.mxu1 %v256_v46  ;;  %v3196_v46 = vld [vmem:[%s4548_s7 + $0x354] ss:$28 sps:$4 sm:$0xff]  }
 0x1bf   :  { %696 = vmatmul.mubr.bf16.vlgmr.msra.gmra.mrb[0].mxu0 %v255_v49  ;;  %737 = vmatmul.mubr.bf16.vlgmr.msra.gmra.mrb[8].mxu1 %v255_v49  ;;  %v3199_v49 = vld [vmem:[%s4548_s7 + $0x384] ss:$28 sps:$4 sm:$0xff]  }
 0x1c0   :  { %2199 = vmatpush1.bf16.msra.mxu0 %v3101_v47  ;;  %2281 = vmatpush1.bf16.msra.mxu1 %v3104_v48  ;;  %v3191_v47 = vld [vmem:[%s4548_s7 + $0x348] ss:$28 sps:$4 sm:$0xff]   ;;  %v3194_v48 = vld [vmem:[%s4548_s7 + $0x350] ss:$28 sps:$4 sm:$0xff]  }
 0x1c1   :  { %2200 = vmatprep.subr.bf16.mxu0 %v3109_v50  ;;  %2282 = vmatprep.subr.bf16.mxu1 %v3112_v51  ;;  %v3202_v50 = vld [vmem:[%s4548_s7 + $0x38c] ss:$28 sps:$4 sm:$0xff]   ;;  %v3993_v51 = vld [vmem:[%s4547_s6] sm:$0xf] }
 0x1c4   :  { %2201 = vmatpush1.bf16.msra.mxu0 %v3107_v52  ;;  %2283 = vmatpush1.bf16.msra.mxu1 %v3110_v53  ;;  %v337_v52 = vsub.s32 3, %v3785_v32  ;;  %v326_v53 = vrot.slane %v3993_v51, %v3788_v33 }
 0x1c5   :  { %2202 = vmatprep.subr.bf16.mxu0 %v3115_v54  ;;  %2284 = vmatprep.subr.bf16.mxu1 %v3118_v55  ;;  %v330_v54 = vrot.slane %v3993_v51, %v3794_v35 }
 0x1c6   :  { %v338_v55 = vrot.slane %v3993_v51, %v337_v52 }
 0x1c8   :  { %2203 = vmatpush1.bf16.msra.mxu0 %v3113_v56  ;;  %2285 = vmatpush1.bf16.msra.mxu1 %v3116_v57 }
 0x1c9   :  { %2204 = vmatprep.subr.bf16.mxu0 %v3121_v58  ;;  %2286 = vmatprep.subr.bf16.mxu1 %v3124_v59 }
 0x1cc   :  { %2205 = vmatpush1.bf16.msra.mxu0 %v3119_v60  ;;  %2287 = vmatpush1.bf16.msra.mxu1 %v3122_v61 }
 0x1cd   :  { %2206 = vmatprep.subr.bf16.mxu0 %v3127_v62  ;;  %2288 = vmatprep.subr.bf16.mxu1 %v3130_v63 }
 0x1d0   :  { %2207 = vmatpush1.bf16.msra.mxu0 %v3125_v0  ;;  %2289 = vmatpush1.bf16.msra.mxu1 %v3128_v1 }
 0x1d1   :  { %2208 = vmatprep.subr.bf16.mxu0 %v3133_v2  ;;  %2290 = vmatprep.subr.bf16.mxu1 %v3136_v3 }
 0x1d4   :  { %2209 = vmatpush1.bf16.msra.mxu0 %v3131_v4  ;;  %2291 = vmatpush1.bf16.msra.mxu1 %v3134_v5 }
 0x1d5   :  { %2210 = vmatprep.subr.bf16.mxu0 %v3139_v6  ;;  %2292 = vmatprep.subr.bf16.mxu1 %v3142_v7  ;;  %v3197_v7 = vld [vmem:[%s4548_s7 + $0x380] ss:$28 sps:$4 sm:$0xff]  }
 0x1d8   :  { %2211 = vmatpush1.bf16.msra.mxu0 %v3137_v8  ;;  %2293 = vmatpush1.bf16.msra.mxu1 %v3140_v9  ;;  %v3200_v8 = vld [vmem:[%s4548_s7 + $0x388] ss:$28 sps:$4 sm:$0xff]  }
 0x1d9   :  { %2212 = vmatprep.subr.bf16.mxu0 %v3145_v10  ;;  %2294 = vmatprep.subr.bf16.mxu1 %v3148_v11  ;;  %v3205_v10 = vld [vmem:[%s4548_s7 + $0x3bc] ss:$28 sps:$4 sm:$0xff]   ;;  %v3208_v11 = vld [vmem:[%s4548_s7 + $0x3c4] ss:$28 sps:$4 sm:$0xff]  }
 0x1dc   :  { %2213 = vmatpush1.bf16.msra.mxu0 %v3143_v12  ;;  %2295 = vmatpush1.bf16.msra.mxu1 %v3146_v13  ;;  %v3203_v13 = vld [vmem:[%s4548_s7 + $0x3b8] ss:$28 sps:$4 sm:$0xff]  }
 0x1dd   :  { %2214 = vmatprep.subr.bf16.mxu0 %v3151_v14  ;;  %2296 = vmatprep.subr.bf16.mxu1 %v3154_v15  ;;  %v3206_v14 = vld [vmem:[%s4548_s7 + $0x3c0] ss:$28 sps:$4 sm:$0xff]   ;;  %v3211_v15 = vld [vmem:[%s4548_s7 + $0x3f4] ss:$28 sps:$4 sm:$0xff]  }
 0x1e0   :  { %2215 = vmatpush1.bf16.msra.mxu0 %v3149_v16  ;;  %2297 = vmatpush1.bf16.msra.mxu1 %v3152_v17  ;;  %v3214_v16 = vld [vmem:[%s4548_s7 + $0x3fc] ss:$28 sps:$4 sm:$0xff]   ;;  %v3209_v17 = vld [vmem:[%s4548_s7 + $0x3f0] ss:$28 sps:$4 sm:$0xff]  }
 0x1e1   :  { %2216 = vmatprep.subr.bf16.mxu0 %v3157_v18  ;;  %2298 = vmatprep.subr.bf16.mxu1 %v3160_v19  ;;  %v3212_v18 = vld [vmem:[%s4548_s7 + $0x3f8] ss:$28 sps:$4 sm:$0xff]   ;;  %v3217_v19 = vld [vmem:[%s4548_s7 + $0x42c] ss:$28 sps:$4 sm:$0xff]  }
 0x1e4   :  { %2217 = vmatpush1.bf16.msra.mxu0 %v3155_v20  ;;  %2299 = vmatpush1.bf16.msra.mxu1 %v3158_v21  ;;  %v3220_v20 = vld [vmem:[%s4548_s7 + $0x434] ss:$28 sps:$4 sm:$0xff]   ;;  %v3215_v21 = vld [vmem:[%s4548_s7 + $0x428] ss:$28 sps:$4 sm:$0xff]  }
 0x1e5   :  { %2218 = vmatprep.subr.bf16.mxu0 %v3163_v22  ;;  %2300 = vmatprep.subr.bf16.mxu1 %v3166_v23  ;;  %v3218_v22 = vld [vmem:[%s4548_s7 + $0x430] ss:$28 sps:$4 sm:$0xff]   ;;  %v3223_v23 = vld [vmem:[%s4548_s7 + $0x464] ss:$28 sps:$4 sm:$0xff]  }
 0x1e8   :  { %2219 = vmatpush1.bf16.msra.mxu0 %v3161_v24  ;;  %2301 = vmatpush1.bf16.msra.mxu1 %v3164_v25  ;;  %v3226_v24 = vld [vmem:[%s4548_s7 + $0x46c] ss:$28 sps:$4 sm:$0xff]   ;;  %v3221_v25 = vld [vmem:[%s4548_s7 + $0x460] ss:$28 sps:$4 sm:$0xff]  }
 0x1e9   :  { %2220 = vmatprep.subr.bf16.mxu0 %v3169_v26  ;;  %2302 = vmatprep.subr.bf16.mxu1 %v3172_v27  ;;  %v3224_v26 = vld [vmem:[%s4548_s7 + $0x468] ss:$28 sps:$4 sm:$0xff]   ;;  %v3229_v27 = vld [vmem:[%s4548_s7 + $0x49c] ss:$28 sps:$4 sm:$0xff]  }
 0x1ec   :  { %2221 = vmatpush1.bf16.msra.mxu0 %v3167_v28  ;;  %2303 = vmatpush1.bf16.msra.mxu1 %v3170_v29  ;;  %v3232_v28 = vld [vmem:[%s4548_s7 + $0x4a4] ss:$28 sps:$4 sm:$0xff]   ;;  %v3227_v29 = vld [vmem:[%s4548_s7 + $0x498] ss:$28 sps:$4 sm:$0xff]  }
 0x1ed   :  { %2222 = vmatprep.subr.bf16.mxu0 %v3175_v30  ;;  %2304 = vmatprep.subr.bf16.mxu1 %v3178_v31  ;;  %v3230_v30 = vld [vmem:[%s4548_s7 + $0x4a0] ss:$28 sps:$4 sm:$0xff]   ;;  %v3235_v31 = vld [vmem:[%s4548_s7 + $0x4d4] ss:$28 sps:$4 sm:$0xff]  }
 0x1f0   :  { %2223 = vmatpush1.bf16.msra.mxu0 %v3173_v34  ;;  %2305 = vmatpush1.bf16.msra.mxu1 %v3176_v36  ;;  %v3238_v34 = vld [vmem:[%s4548_s7 + $0x4dc] ss:$28 sps:$4 sm:$0xff]   ;;  %v3233_v36 = vld [vmem:[%s4548_s7 + $0x4d0] ss:$28 sps:$4 sm:$0xff]  }
 0x1f1   :  { %2224 = vmatprep.subr.bf16.mxu0 %v3181_v37  ;;  %2306 = vmatprep.subr.bf16.mxu1 %v3184_v38  ;;  %v3236_v37 = vld [vmem:[%s4548_s7 + $0x4d8] ss:$28 sps:$4 sm:$0xff]   ;;  %v3241_v38 = vld [vmem:[%s4548_s7 + $0x50c] ss:$28 sps:$4 sm:$0xff]  }
 0x1f4   :  { %2225 = vmatpush1.bf16.msra.mxu0 %v3179_v39  ;;  %2307 = vmatpush1.bf16.msra.mxu1 %v3182_v40  ;;  %v3244_v39 = vld [vmem:[%s4548_s7 + $0x514] ss:$28 sps:$4 sm:$0xff]   ;;  %v3239_v40 = vld [vmem:[%s4548_s7 + $0x508] ss:$28 sps:$4 sm:$0xff]  }
 0x1f5   :  { %2226 = vmatprep.subr.bf16.mxu0 %v3187_v41  ;;  %2308 = vmatprep.subr.bf16.mxu1 %v3190_v42  ;;  %v3242_v41 = vld [vmem:[%s4548_s7 + $0x510] ss:$28 sps:$4 sm:$0xff]   ;;  %v3247_v42 = vld [vmem:[%s4548_s7 + $0x544] ss:$28 sps:$4 sm:$0xff]  }
 0x1f8   :  { %2227 = vmatpush1.bf16.msra.mxu0 %v3185_v43  ;;  %2309 = vmatpush1.bf16.msra.mxu1 %v3188_v44  ;;  %v3250_v43 = vld [vmem:[%s4548_s7 + $0x54c] ss:$28 sps:$4 sm:$0xff]   ;;  %v3245_v44 = vld [vmem:[%s4548_s7 + $0x540] ss:$28 sps:$4 sm:$0xff]  }
 0x1f9   :  { %2228 = vmatprep.subr.bf16.mxu0 %v3193_v45  ;;  %2310 = vmatprep.subr.bf16.mxu1 %v3196_v46  ;;  %v3248_v45 = vld [vmem:[%s4548_s7 + $0x548] ss:$28 sps:$4 sm:$0xff]   ;;  %v3253_v46 = vld [vmem:[%s4548_s7 + $0x57c] ss:$28 sps:$4 sm:$0xff]  }
 0x1fc   :  { %2229 = vmatpush1.bf16.msra.mxu0 %v3191_v47  ;;  %2311 = vmatpush1.bf16.msra.mxu1 %v3194_v48  ;;  %v3256_v47 = vld [vmem:[%s4548_s7 + $0x584] ss:$28 sps:$4 sm:$0xff]   ;;  %v3251_v48 = vld [vmem:[%s4548_s7 + $0x578] ss:$28 sps:$4 sm:$0xff]  }
 0x1fd   :  { %2239 = vmatprep.subr.bf16.mxu0 %v3199_v49  ;;  %2321 = vmatprep.subr.bf16.mxu1 %v3202_v50  ;;  %v3254_v49 = vld [vmem:[%s4548_s7 + $0x580] ss:$28 sps:$4 sm:$0xff]   ;;  %v3259_v50 = vld [vmem:[%s4548_s7 + $0x5b4] ss:$28 sps:$4 sm:$0xff]  }
 0x292   :  { %v697_v56 = vpop.f32.mrb[0].mxu0  ;;  %v4003_v57 = vpop.f32.mrb[8].mxu1 }
 0x293   :  { %v698_v58 = vadd.f32 %v697_v56, %v326_v53  ;;  %v699_v59 = vpop.f32.mrb[1].mxu0  ;;  %v740_v60 = vpop.f32.mrb[9].mxu1  ;;  %v3262_v53 = vld [vmem:[%s4548_s7 + $0x5bc] ss:$28 sps:$4 sm:$0xff]   ;;  %v3265_v56 = vld [vmem:[%s4548_s7 + $0x5ec] ss:$28 sps:$4 sm:$0xff]  }
 0x294   :  { %v700_v61 = vadd.f32 %v699_v59, %v330_v54  ;;  %v741_v62 = vadd.f32 %v740_v60, %v338_v55  ;;  %v701_v63 = vpop.f32.mrb[2].mxu0  ;;  %v742_v0 = vpop.f32.mrb[10].mxu1  ;;  %v3257_v54 = vld [vmem:[%s4548_s7 + $0x5b0] ss:$28 sps:$4 sm:$0xff]   ;;  %v3260_v55 = vld [vmem:[%s4548_s7 + $0x5b8] ss:$28 sps:$4 sm:$0xff]  }
 0x295   :  { %v745_v1 = vmax.f32 %v698_v58, 0.0  ;;  %v702_v2 = vpop.f32.mrb[3].mxu0  ;;  %v743_v3 = vpop.f32.mrb[11].mxu1  ;;  %v3268_v58 = vld [vmem:[%s4548_s7 + $0x5f4] ss:$28 sps:$4 sm:$0xff]  }
 0x296   :  { %v746_v4 = vmax.f32 %v700_v61, 0.0  ;;  %v748_v5 = vmax.f32 %v741_v62, 0.0  ;;  %v3263_v59 = vld [vmem:[%s4548_s7 + $0x5e8] ss:$28 sps:$4 sm:$0xff]   ;;  %v3266_v60 = vld [vmem:[%s4548_s7 + $0x5f0] ss:$28 sps:$4 sm:$0xff]  }
 0x297   :  { %v4013_v9 = vpack.c.bf16 %v745_v1, %v745_v1  ;;  %v3271_v61 = vld [vmem:[%s4548_s7 + $0x624] ss:$28 sps:$4 sm:$0xff]   ;;  %v3274_v62 = vld [vmem:[%s4548_s7 + $0x62c] ss:$28 sps:$4 sm:$0xff]   ;;  %v333_v1 = vsub.s32 2, %v3785_v32 }
 0x298   :  { %v4005_v6 = vpack.c.bf16 %v746_v4, %v746_v4  ;;  %v4023_v12 = vpack.c.bf16 %v748_v5, %v748_v5  ;;  %v3269_v63 = vld [vmem:[%s4548_s7 + $0x620] ss:$28 sps:$4 sm:$0xff]   ;;  %v3272_v0 = vld [vmem:[%s4548_s7 + $0x628] ss:$28 sps:$4 sm:$0xff]   ;;  %v3275_v4 = vld [vmem:[%s4548_s7 + $0x658] ss:$28 sps:$4 sm:$0xff]  }
 0x299   :  { %v3277_v2 = vld [vmem:[%s4548_s7 + $0x65c] ss:$28 sps:$4 sm:$0xff]   ;;  %v3280_v3 = vld [vmem:[%s4548_s7 + $0x664] ss:$28 sps:$4 sm:$0xff]  }
 0x29a   :  { %2230 = vmatprep.mubr.bf16.mxu0 %v4005_v6  ;;  %2312 = vmatprep.mubr.bf16.mxu1 %v4005_v6  ;;  %v3278_v5 = vld [vmem:[%s4548_s7 + $0x660] ss:$28 sps:$4 sm:$0xff]  }
 0x29b   :  { %2231 = vmatmul.mubr.bf16.vlgmr.msra.gmra.mrb[4].mxu0 %v4013_v9  ;;  %2313 = vmatmul.mubr.bf16.vlgmr.msra.gmra.mrb[12].mxu1 %v4013_v9 }
 0x29c   :  { %2240 = vmatpush1.bf16.msra.mxu0 %v3197_v7  ;;  %2322 = vmatpush1.bf16.msra.mxu1 %v3200_v8  ;;  %v334_v7 = vrot.slane %v3993_v51, %v333_v1  ;;  %v3283_v8 = vld [vmem:[%s4548_s7 + $0x694] ss:$28 sps:$4 sm:$0xff]  }
 0x29d   :  { %2271 = vmatprep.mubr.bf16.mxu0 %v4023_v12  ;;  %2353 = vmatprep.mubr.bf16.mxu1 %v4023_v12  ;;  %v3284_v51 = vld [vmem:[%s4548_s7 + $0x698] ss:$28 sps:$4 sm:$0xff]  }
 0x29e   :  { %2241 = vmatprep.subr.bf16.mxu0 %v3205_v10  ;;  %2323 = vmatprep.subr.bf16.mxu1 %v3208_v11  ;;  %v3286_v10 = vld [vmem:[%s4548_s7 + $0x69c] ss:$28 sps:$4 sm:$0xff]   ;;  %v3281_v11 = vld [vmem:[%s4548_s7 + $0x690] ss:$28 sps:$4 sm:$0xff]  }
 0x2a0   :  { %2242 = vmatpush1.bf16.msra.mxu0 %v3203_v13  ;;  %2324 = vmatpush1.bf16.msra.mxu1 %v3206_v14  ;;  %v739_v13 = vadd.f32 %v4003_v57, %v334_v7  ;;  %v3289_v14 = vld [vmem:[%s4548_s7 + $0x6cc] ss:$28 sps:$4 sm:$0xff]   ;;  %v3351_v7 = vld [vmem:[%s4548_s7 + $0x600] ss:$28 sps:$4 sm:$0xff]  }
 0x2a1   :  { %2243 = vmatprep.subr.bf16.mxu0 %v3211_v15  ;;  %2325 = vmatprep.subr.bf16.mxu1 %v3214_v16  ;;  %v3292_v15 = vld [vmem:[%s4548_s7 + $0x6d4] ss:$28 sps:$4 sm:$0xff]   ;;  %v3287_v16 = vld [vmem:[%s4548_s7 + $0x6c8] ss:$28 sps:$4 sm:$0xff]  }
 0x2a2   :  { %v3290_v57 = vld [vmem:[%s4548_s7 + $0x6d0] ss:$28 sps:$4 sm:$0xff]  }
 0x2a4   :  { %2244 = vmatpush1.bf16.msra.mxu0 %v3209_v17  ;;  %2326 = vmatpush1.bf16.msra.mxu1 %v3212_v18  ;;  %v747_v17 = vmax.f32 %v739_v13, 0.0  ;;  %v3295_v18 = vld [vmem:[%s4548_s7 + $0x14] ss:$28 sps:$4 sm:$0xff]  }
 0x2a5   :  { %2245 = vmatprep.subr.bf16.mxu0 %v3217_v19  ;;  %2327 = vmatprep.subr.bf16.mxu1 %v3220_v20  ;;  %v3296_v19 = vld [vmem:[%s4548_s7 + $0x1d8] ss:$28 sps:$4 sm:$0xff]   ;;  %v3293_v20 = vld [vmem:[%s4548_s7 + $0x10] ss:$28 sps:$4 sm:$0xff]  }
 0x2a6   :  { %v3353_v13 = vld [vmem:[%s4548_s7 + $0x2b0] ss:$28 sps:$4 sm:$0xff]  }
 0x2a8   :  { %2246 = vmatpush1.bf16.msra.mxu0 %v3215_v21  ;;  %2328 = vmatpush1.bf16.msra.mxu1 %v3218_v22  ;;  %v4217_v21 = vpack.c.bf16 %v747_v17, %v747_v17  ;;  %v3297_v22 = vld [vmem:[%s4548_s7 + $0x18] ss:$28 sps:$4 sm:$0xff]   ;;  %v3362_v17 = vld [vmem:[%s4548_s7 + $0x4b0] ss:$28 sps:$4 sm:$0xff]  }
 0x2a9   :  { %2247 = vmatprep.subr.bf16.mxu0 %v3223_v23  ;;  %2329 = vmatprep.subr.bf16.mxu1 %v3226_v24  ;;  %v3300_v23 = vld [vmem:[%s4548_s7 + $0x4c] ss:$28 sps:$4 sm:$0xff]  }
 0x2aa   :  { %v3301_v24 = vld [vmem:[%s4548_s7 + $0x210] ss:$28 sps:$4 sm:$0xff]  }
 0x2ac   :  { %2248 = vmatpush1.bf16.msra.mxu0 %v3221_v25  ;;  %2330 = vmatpush1.bf16.msra.mxu1 %v3224_v26  ;;  %v3298_v25 = vld [vmem:[%s4548_s7 + $0x48] ss:$28 sps:$4 sm:$0xff]   ;;  %v3302_v26 = vld [vmem:[%s4548_s7 + $0x50] ss:$28 sps:$4 sm:$0xff]  }
 0x2ad   :  { %2249 = vmatprep.subr.bf16.mxu0 %v3229_v27  ;;  %2331 = vmatprep.subr.bf16.mxu1 %v3232_v28  ;;  %v3305_v27 = vld [vmem:[%s4548_s7 + $0x84] ss:$28 sps:$4 sm:$0xff]  }
 0x2ae   :  { %v3306_v28 = vld [vmem:[%s4548_s7 + $0x248] ss:$28 sps:$4 sm:$0xff]  }
 0x2b0   :  { %2250 = vmatpush1.bf16.msra.mxu0 %v3227_v29  ;;  %2332 = vmatpush1.bf16.msra.mxu1 %v3230_v30  ;;  %v3303_v29 = vld [vmem:[%s4548_s7 + $0x80] ss:$28 sps:$4 sm:$0xff]  }
 0x2b1   :  { %2251 = vmatprep.subr.bf16.mxu0 %v3235_v31  ;;  %2333 = vmatprep.subr.bf16.mxu1 %v3238_v34  ;;  %v3310_v30 = vld [vmem:[%s4548_s7 + $0xbc] ss:$28 sps:$4 sm:$0xff]  }
 0x2b2   :  { %v3311_v31 = vld [vmem:[%s4548_s7 + $0x280] ss:$28 sps:$4 sm:$0xff]   ;;  %v3308_v34 = vld [vmem:[%s4548_s7 + $0xb8] ss:$28 sps:$4 sm:$0xff]  }
 0x2b4   :  { %2252 = vmatpush1.bf16.msra.mxu0 %v3233_v36  ;;  %2334 = vmatpush1.bf16.msra.mxu1 %v3236_v37  ;;  %v3312_v36 = vld [vmem:[%s4548_s7 + $0xc0] ss:$28 sps:$4 sm:$0xff]   ;;  %v3315_v37 = vld [vmem:[%s4548_s7 + $0xf4] ss:$28 sps:$4 sm:$0xff]  }
 0x2b5   :  { %2253 = vmatprep.subr.bf16.mxu0 %v3241_v38  ;;  %2335 = vmatprep.subr.bf16.mxu1 %v3244_v39  ;;  %v3316_v38 = vld [vmem:[%s4548_s7 + $0x2b8] ss:$28 sps:$4 sm:$0xff]   ;;  %v3313_v39 = vld [vmem:[%s4548_s7 + $0xf0] ss:$28 sps:$4 sm:$0xff]  }
 0x2b8   :  { %2254 = vmatpush1.bf16.msra.mxu0 %v3239_v40  ;;  %2336 = vmatpush1.bf16.msra.mxu1 %v3242_v41  ;;  %v3317_v40 = vld [vmem:[%s4548_s7 + $0xf8] ss:$28 sps:$4 sm:$0xff]   ;;  %v3320_v41 = vld [vmem:[%s4548_s7 + $0x12c] ss:$28 sps:$4 sm:$0xff]  }
 0x2b9   :  { %2255 = vmatprep.subr.bf16.mxu0 %v3247_v42  ;;  %2337 = vmatprep.subr.bf16.mxu1 %v3250_v43  ;;  %v3321_v42 = vld [vmem:[%s4548_s7 + $0x2f0] ss:$28 sps:$4 sm:$0xff]   ;;  %v3318_v43 = vld [vmem:[%s4548_s7 + $0x128] ss:$28 sps:$4 sm:$0xff]  }
 0x2bc   :  { %2256 = vmatpush1.bf16.msra.mxu0 %v3245_v44  ;;  %2338 = vmatpush1.bf16.msra.mxu1 %v3248_v45  ;;  %v3322_v44 = vld [vmem:[%s4548_s7 + $0x130] ss:$28 sps:$4 sm:$0xff]   ;;  %v3325_v45 = vld [vmem:[%s4548_s7 + $0x164] ss:$28 sps:$4 sm:$0xff]  }
 0x2bd   :  { %2257 = vmatprep.subr.bf16.mxu0 %v3253_v46  ;;  %2339 = vmatprep.subr.bf16.mxu1 %v3256_v47  ;;  %v3326_v46 = vld [vmem:[%s4548_s7 + $0x328] ss:$28 sps:$4 sm:$0xff]   ;;  %v3323_v47 = vld [vmem:[%s4548_s7 + $0x160] ss:$28 sps:$4 sm:$0xff]  }
 0x2c0   :  { %2258 = vmatpush1.bf16.msra.mxu0 %v3251_v48  ;;  %2340 = vmatpush1.bf16.msra.mxu1 %v3254_v49  ;;  %v3327_v48 = vld [vmem:[%s4548_s7 + $0x168] ss:$28 sps:$4 sm:$0xff]   ;;  %v3330_v49 = vld [vmem:[%s4548_s7 + $0x19c] ss:$28 sps:$4 sm:$0xff]  }
 0x2c1   :  { %2259 = vmatprep.subr.bf16.mxu0 %v3259_v50  ;;  %2341 = vmatprep.subr.bf16.mxu1 %v3262_v53  ;;  %v3331_v50 = vld [vmem:[%s4548_s7 + $0x360] ss:$28 sps:$4 sm:$0xff]   ;;  %v3328_v53 = vld [vmem:[%s4548_s7 + $0x198] ss:$28 sps:$4 sm:$0xff]  }
 0x2c4   :  { %2260 = vmatpush1.bf16.msra.mxu0 %v3257_v54  ;;  %2342 = vmatpush1.bf16.msra.mxu1 %v3260_v55  ;;  %v3332_v54 = vld [vmem:[%s4548_s7 + $0x1a0] ss:$28 sps:$4 sm:$0xff]   ;;  %v3335_v55 = vld [vmem:[%s4548_s7 + $0x1d4] ss:$28 sps:$4 sm:$0xff]  }
 0x2c5   :  { %2261 = vmatprep.subr.bf16.mxu0 %v3265_v56  ;;  %2343 = vmatprep.subr.bf16.mxu1 %v3268_v58  ;;  %v3336_v56 = vld [vmem:[%s4548_s7 + $0x558] ss:$28 sps:$4 sm:$0xff]   ;;  %v3333_v58 = vld [vmem:[%s4548_s7 + $0x1d0] ss:$28 sps:$4 sm:$0xff]  }
 0x2c8   :  { %2262 = vmatpush1.bf16.msra.mxu0 %v3263_v59  ;;  %2344 = vmatpush1.bf16.msra.mxu1 %v3266_v60  ;;  %v3337_v59 = vld [vmem:[%s4548_s7 + $0x398] ss:$28 sps:$4 sm:$0xff]   ;;  %v3340_v60 = vld [vmem:[%s4548_s7 + $0x20c] ss:$28 sps:$4 sm:$0xff]  }
 0x2c9   :  { %2263 = vmatprep.subr.bf16.mxu0 %v3271_v61  ;;  %2345 = vmatprep.subr.bf16.mxu1 %v3274_v62  ;;  %v3341_v61 = vld [vmem:[%s4548_s7 + $0x590] ss:$28 sps:$4 sm:$0xff]   ;;  %v3338_v62 = vld [vmem:[%s4548_s7 + $0x208] ss:$28 sps:$4 sm:$0xff]  }
 0x2cc   :  { %2264 = vmatpush1.bf16.msra.mxu0 %v3269_v63  ;;  %2346 = vmatpush1.bf16.msra.mxu1 %v3272_v0  ;;  %v3342_v63 = vld [vmem:[%s4548_s7 + $0x3d0] ss:$28 sps:$4 sm:$0xff]   ;;  %v3345_v0 = vld [vmem:[%s4548_s7 + $0x244] ss:$28 sps:$4 sm:$0xff]  }
 0x2cd   :  { %2265 = vmatprep.subr.bf16.mxu0 %v3277_v2  ;;  %2347 = vmatprep.subr.bf16.mxu1 %v3280_v3  ;;  %v3346_v2 = vld [vmem:[%s4548_s7 + $0x5c8] ss:$28 sps:$4 sm:$0xff]   ;;  %v3343_v3 = vld [vmem:[%s4548_s7 + $0x240] ss:$28 sps:$4 sm:$0xff]  }
 0x2d0   :  { %2266 = vmatpush1.bf16.msra.mxu0 %v3275_v4  ;;  %2348 = vmatpush1.bf16.msra.mxu1 %v3278_v5  ;;  %v3347_v4 = vld [vmem:[%s4548_s7 + $0x408] ss:$28 sps:$4 sm:$0xff]   ;;  %v3350_v5 = vld [vmem:[%s4548_s7 + $0x27c] ss:$28 sps:$4 sm:$0xff]  }
 0x2d1   :  { %2267 = vmatprep.subr.bf16.mxu0 %v3283_v8  ;;  %2349 = vmatprep.subr.bf16.mxu1 %v3286_v10  ;;  %v3348_v8 = vld [vmem:[%s4548_s7 + $0x278] ss:$28 sps:$4 sm:$0xff]   ;;  %v3352_v10 = vld [vmem:[%s4548_s7 + $0x440] ss:$28 sps:$4 sm:$0xff]  }
 0x2d4   :  { %2268 = vmatpush1.bf16.msra.mxu0 %v3281_v11  ;;  %2350 = vmatpush1.bf16.msra.mxu1 %v3284_v51  ;;  %v3355_v11 = vld [vmem:[%s4548_s7 + $0x2b4] ss:$28 sps:$4 sm:$0xff]  }
 0x2d5   :  { %2269 = vmatprep.subr.bf16.mxu0 %v3289_v14  ;;  %2351 = vmatprep.subr.bf16.mxu1 %v3292_v15  ;;  %v3356_v51 = vld [vmem:[%s4548_s7 + $0x638] ss:$28 sps:$4 sm:$0xff]   ;;  %v3360_v15 = vld [vmem:[%s4548_s7 + $0x2ec] ss:$28 sps:$4 sm:$0xff]  }
 0x2d6   :  { %v3357_v14 = vld [vmem:[%s4548_s7 + $0x478] ss:$28 sps:$4 sm:$0xff]  }
 0x2d8   :  { %2270 = vmatpush1.bf16.msra.mxu0 %v3287_v16  ;;  %2352 = vmatpush1.bf16.msra.mxu1 %v3290_v57  ;;  %v3361_v16 = vld [vmem:[%s4548_s7 + $0x670] ss:$28 sps:$4 sm:$0xff]   ;;  %v3358_v57 = vld [vmem:[%s4548_s7 + $0x2e8] ss:$28 sps:$4 sm:$0xff]  }
 0x2d9   :  { %2362 = vmatprep.subr.bf16.mxu0 %v3295_v18  ;;  %2905 = vmatprep.subr.bf16.mxu1 %v3296_v19  ;;  %v3365_v18 = vld [vmem:[%s4548_s7 + $0x324] ss:$28 sps:$4 sm:$0xff]  }
 0x2da   :  { %v3366_v19 = vld [vmem:[%s4548_s7 + $0x6a8] ss:$28 sps:$4 sm:$0xff]  }
 0x2db   :  { %2272 = vmatmul.mubr.bf16.vlgmr.msra.gmra.mrb[4].mxu0 %v4217_v21  ;;  %2354 = vmatmul.mubr.bf16.vlgmr.msra.gmra.mrb[12].mxu1 %v4217_v21 }
 0x2dc   :  { %2363 = vmatpush1.bf16.msra.mxu0 %v3293_v20  ;;  %2394 = vmatprep.mubr.bf16.mxu0 %v4005_v6  ;;  %v3363_v20 = vld [vmem:[%s4548_s7 + $0x320] ss:$28 sps:$4 sm:$0xff]  }
 0x2dd   :  { %2906 = vmatpush3.bf16.msra.mxu1 %v3297_v22  ;;  %2476 = vmatprep.mubr.bf16.mxu1 %v4005_v6  ;;  %v3307_v6 = vld [vmem:[%s4548_s7 + $0x88] ss:$28 sps:$4 sm:$0xff]  }
 0x2de   :  { %2364 = vmatprep.subr.bf16.mxu0 %v3300_v23  ;;  %2907 = vmatprep.subr.bf16.mxu1 %v3301_v24  ;;  %v3367_v22 = vld [vmem:[%s4548_s7 + $0x4e8] ss:$28 sps:$4 sm:$0xff]   ;;  %v3370_v23 = vld [vmem:[%s4548_s7 + $0x35c] ss:$28 sps:$4 sm:$0xff]  }
 0x2df   :  { %v3371_v24 = vld [vmem:[%s4548_s7 + $0x6e0] ss:$28 sps:$4 sm:$0xff]  }
 0x2e0   :  { %2365 = vmatpush1.bf16.msra.mxu0 %v3298_v25  ;;  %v3368_v25 = vld [vmem:[%s4548_s7 + $0x358] ss:$28 sps:$4 sm:$0xff]  }
 0x2e1   :  { %2908 = vmatpush3.bf16.msra.mxu1 %v3302_v26  ;;  %2366 = vmatprep.subr.bf16.mxu0 %v3305_v27  ;;  %v3372_v26 = vld [vmem:[%s4548_s7 + $0x520] ss:$28 sps:$4 sm:$0xff]   ;;  %v3375_v27 = vld [vmem:[%s4548_s7 + $0x394] ss:$28 sps:$4 sm:$0xff]  }
 0x2e2   :  { %2909 = vmatprep.subr.bf16.mxu1 %v3306_v28  ;;  %v3373_v28 = vld [vmem:[%s4548_s7 + $0x390] ss:$28 sps:$4 sm:$0xff]  }
 0x2e4   :  { %2367 = vmatpush1.bf16.msra.mxu0 %v3303_v29  ;;  %v3378_v29 = vld [vmem:[%s4548_s7 + $0x3cc] ss:$28 sps:$4 sm:$0xff]  }
 0x2e5   :  { %2910 = vmatpush3.bf16.msra.mxu1 %v3307_v6  ;;  %2368 = vmatprep.subr.bf16.mxu0 %v3310_v30  ;;  %v3376_v6 = vld [vmem:[%s4548_s7 + $0x3c8] ss:$28 sps:$4 sm:$0xff]  }
 0x2e6   :  { %2911 = vmatprep.subr.bf16.mxu1 %v3311_v31  ;;  %v3381_v30 = vld [vmem:[%s4548_s7 + $0x404] ss:$28 sps:$4 sm:$0xff]  }
 0x2e7   :  { %v3379_v31 = vld [vmem:[%s4548_s7 + $0x400] ss:$28 sps:$4 sm:$0xff]  }
 0x2e8   :  { %2369 = vmatpush1.bf16.msra.mxu0 %v3308_v34  ;;  %v3387_v34 = vld [vmem:[%s4548_s7 + $0x474] ss:$28 sps:$4 sm:$0xff]  }
 0x2e9   :  { %2912 = vmatpush3.bf16.msra.mxu1 %v3312_v36  ;;  %2370 = vmatprep.subr.bf16.mxu0 %v3315_v37  ;;  %v3385_v36 = vld [vmem:[%s4548_s7 + $0x470] ss:$28 sps:$4 sm:$0xff]  }
 0x2ea   :  { %2913 = vmatprep.subr.bf16.mxu1 %v3316_v38  ;;  %v3390_v37 = vld [vmem:[%s4548_s7 + $0x4ac] ss:$28 sps:$4 sm:$0xff]  }
 0x2eb   :  { %v3388_v38 = vld [vmem:[%s4548_s7 + $0x4a8] ss:$28 sps:$4 sm:$0xff]  }
 0x2ec   :  { %2371 = vmatpush1.bf16.msra.mxu0 %v3313_v39  ;;  %v3393_v39 = vld [vmem:[%s4548_s7 + $0x4e4] ss:$28 sps:$4 sm:$0xff]  }
 0x2ed   :  { %2914 = vmatpush3.bf16.msra.mxu1 %v3317_v40  ;;  %2372 = vmatprep.subr.bf16.mxu0 %v3320_v41  ;;  %v3391_v40 = vld [vmem:[%s4548_s7 + $0x4e0] ss:$28 sps:$4 sm:$0xff]  }
 0x2ee   :  { %2915 = vmatprep.subr.bf16.mxu1 %v3321_v42  ;;  %v3396_v41 = vld [vmem:[%s4548_s7 + $0x51c] ss:$28 sps:$4 sm:$0xff]  }
 0x2ef   :  { %v3394_v42 = vld [vmem:[%s4548_s7 + $0x518] ss:$28 sps:$4 sm:$0xff]  }
 0x2f0   :  { %2373 = vmatpush1.bf16.msra.mxu0 %v3318_v43  ;;  %v3399_v43 = vld [vmem:[%s4548_s7 + $0x554] ss:$28 sps:$4 sm:$0xff]  }
 0x2f1   :  { %2916 = vmatpush3.bf16.msra.mxu1 %v3322_v44  ;;  %2374 = vmatprep.subr.bf16.mxu0 %v3325_v45  ;;  %v3397_v44 = vld [vmem:[%s4548_s7 + $0x550] ss:$28 sps:$4 sm:$0xff]  }
 0x2f2   :  { %2917 = vmatprep.subr.bf16.mxu1 %v3326_v46  ;;  %v3402_v45 = vld [vmem:[%s4548_s7 + $0x58c] ss:$28 sps:$4 sm:$0xff]  }
 0x2f3   :  { %v3400_v46 = vld [vmem:[%s4548_s7 + $0x588] ss:$28 sps:$4 sm:$0xff]  }
 0x2f4   :  { %2375 = vmatpush1.bf16.msra.mxu0 %v3323_v47  ;;  %v3405_v47 = vld [vmem:[%s4548_s7 + $0x5c4] ss:$28 sps:$4 sm:$0xff]  }
 0x2f5   :  { %2918 = vmatpush3.bf16.msra.mxu1 %v3327_v48  ;;  %2376 = vmatprep.subr.bf16.mxu0 %v3330_v49  ;;  %v3403_v48 = vld [vmem:[%s4548_s7 + $0x5c0] ss:$28 sps:$4 sm:$0xff]  }
 0x2f6   :  { %2919 = vmatprep.subr.bf16.mxu1 %v3331_v50  ;;  %v3408_v49 = vld [vmem:[%s4548_s7 + $0x5fc] ss:$28 sps:$4 sm:$0xff]  }
 0x2f7   :  { %v3406_v50 = vld [vmem:[%s4548_s7 + $0x5f8] ss:$28 sps:$4 sm:$0xff]  }
 0x2f8   :  { %2377 = vmatpush1.bf16.msra.mxu0 %v3328_v53  ;;  %v3411_v53 = vld [vmem:[%s4548_s7 + $0x634] ss:$28 sps:$4 sm:$0xff]  }
 0x2f9   :  { %2920 = vmatpush3.bf16.msra.mxu1 %v3332_v54  ;;  %2378 = vmatprep.subr.bf16.mxu0 %v3335_v55  ;;  %v3409_v54 = vld [vmem:[%s4548_s7 + $0x630] ss:$28 sps:$4 sm:$0xff]  }
 0x2fa   :  { %2927 = vmatprep.subr.bf16.mxu1 %v3336_v56  ;;  %v3414_v55 = vld [vmem:[%s4548_s7 + $0x66c] ss:$28 sps:$4 sm:$0xff]  }
 0x2fb   :  { %v3412_v56 = vld [vmem:[%s4548_s7 + $0x668] ss:$28 sps:$4 sm:$0xff]  }
 0x2fc   :  { %2477 = vmatmul.mubr.bf16.vlgmr.msra.gmra.mrb[16].mxu1 %v4013_v9  ;;  %2379 = vmatpush1.bf16.msra.mxu0 %v3333_v58  ;;  %v3417_v58 = vld [vmem:[%s4548_s7 + $0x6a4] ss:$28 sps:$4 sm:$0xff]  }
 0x2fd   :  { %2928 = vmatpush3.bf16.msra.mxu1 %v3337_v59  ;;  %2516 = vmatprep.mubr.bf16.mxu1 %v4023_v12  ;;  %v3415_v59 = vld [vmem:[%s4548_s7 + $0x6a0] ss:$28 sps:$4 sm:$0xff]  }
 0x2fe   :  { %2380 = vmatprep.subr.bf16.mxu0 %v3340_v60  ;;  %2929 = vmatprep.subr.bf16.mxu1 %v3341_v61  ;;  %v3420_v60 = vld [vmem:[%s4548_s7 + $0x6dc] ss:$28 sps:$4 sm:$0xff]  }
 0x2ff   :  { %v3418_v61 = vld [vmem:[%s4548_s7 + $0x6d8] ss:$28 sps:$4 sm:$0xff]  }
 0x300   :  { %2381 = vmatpush1.bf16.msra.mxu0 %v3338_v62  ;;  %v4511_v62 = vld [vmem:[%s4549_s8] sm:$0xff] }
 0x301   :  { %2930 = vmatpush3.bf16.msra.mxu1 %v3342_v63  ;;  %2382 = vmatprep.subr.bf16.mxu0 %v3345_v0  ;;  %v1014_v63 = vrot.slane %v4511_v62, %v3788_v33  ;;  %v1022_v0 = vrot.slane %v4511_v62, %v333_v1 }
 0x302   :  { %2931 = vmatprep.subr.bf16.mxu1 %v3346_v2  ;;  %v1018_v2 = vrot.slane %v4511_v62, %v3794_v35 }
 0x304   :  { %2383 = vmatpush1.bf16.msra.mxu0 %v3343_v3  ;;  %v1026_v3 = vrot.slane %v4511_v62, %v337_v52 }
 0x305   :  { %2932 = vmatpush3.bf16.msra.mxu1 %v3347_v4  ;;  %2384 = vmatprep.subr.bf16.mxu0 %v3350_v5 }
 0x306   :  { %2933 = vmatprep.subr.bf16.mxu1 %v3351_v7 }
 0x308   :  { %2385 = vmatpush1.bf16.msra.mxu0 %v3348_v8 }
 0x309   :  { %2934 = vmatpush3.bf16.msra.mxu1 %v3352_v10  ;;  %2386 = vmatprep.subr.bf16.mxu0 %v3355_v11 }
 0x30a   :  { %2935 = vmatprep.subr.bf16.mxu1 %v3356_v51 }
 0x30c   :  { %2387 = vmatpush1.bf16.msra.mxu0 %v3353_v13 }
 0x30d   :  { %2936 = vmatpush3.bf16.msra.mxu1 %v3357_v14  ;;  %2388 = vmatprep.subr.bf16.mxu0 %v3360_v15 }
 0x30e   :  { %2937 = vmatprep.subr.bf16.mxu1 %v3361_v16 }
 0x310   :  { %2389 = vmatpush1.bf16.msra.mxu0 %v3358_v57 }
 0x311   :  { %2938 = vmatpush3.bf16.msra.mxu1 %v3362_v17  ;;  %2390 = vmatprep.subr.bf16.mxu0 %v3365_v18 }
 0x312   :  { %2939 = vmatprep.subr.bf16.mxu1 %v3366_v19 }
 0x314   :  { %2391 = vmatpush1.bf16.msra.mxu0 %v3363_v20 }
 0x315   :  { %2940 = vmatpush3.bf16.msra.mxu1 %v3367_v22  ;;  %2392 = vmatprep.subr.bf16.mxu0 %v3370_v23 }
 0x316   :  { %2941 = vmatprep.subr.bf16.mxu1 %v3371_v24 }
 0x318   :  { %2393 = vmatpush1.bf16.msra.mxu0 %v3368_v25 }
 0x319   :  { %2942 = vmatpush3.bf16.msra.mxu1 %v3372_v26  ;;  %2403 = vmatprep.subr.bf16.mxu0 %v3375_v27 }
 0x31b   :  { %2395 = vmatmul.mubr.bf16.vlgmr.msra.gmra.mrb[8].mxu0 %v4013_v9  ;;  %v3384_v9 = vld [vmem:[%s4548_s7 + $0x43c] ss:$28 sps:$4 sm:$0xff]  }
 0x31c   :  { %2517 = vmatmul.mubr.bf16.vlgmr.msra.gmra.mrb[20].mxu1 %v4217_v21  ;;  %2404 = vmatpush1.bf16.msra.mxu0 %v3373_v28 }
 0x31d   :  { %2435 = vmatprep.mubr.bf16.mxu0 %v4023_v12  ;;  %2405 = vmatprep.subr.bf16.mxu0 %v3378_v29  ;;  %v3382_v12 = vld [vmem:[%s4548_s7 + $0x438] ss:$28 sps:$4 sm:$0xff]   ;;  %s3476_s7 = smov [#allocation2]  }
 0x31e   :  { %s2579_s8 = sshll.u32 %s3476_s7, 4  ;;  %s2580_s8 = int_to_ptr.vmem [resolvable:$true] %s2579_s8 }
 0x31f   :  { %s3449_s15 = scalar_lea.vmem %s2580_s8, 896  ;;  %p3454_p1 = scmp.lt.s32.totalorder %s2580_s8, %s2580_s8 }
 0x320   :  { %2406 = vmatpush1.bf16.msra.mxu0 %v3376_v6  ;;  %p3450_p0 = scmp.ne.s32.totalorder %s2580_s8, %s3449_s15  ;;  %p3455_p2 = scmp.lt.s32.totalorder %s3449_s15, %s3449_s15 }
 0x321   :  { %2407 = vmatprep.subr.bf16.mxu0 %v3381_v30 }
 0x322   :  { %p3456_p3 = por %p3455_p2, %p3454_p1 }
 0x324   :  { %2408 = vmatpush1.bf16.msra.mxu0 %v3379_v31  ;;  %p3457_p4 = pnand %p3456_p3, %p3450_p0 }
 0x325   :  { %2409 = vmatprep.subr.bf16.mxu0 %v3384_v9 }
 0x328   :  { %2410 = vmatpush1.bf16.msra.mxu0 %v3382_v12  ;;  %v1037_v12 = vsub.s32 6, %v3785_v32 }
 0x329   :  { %2411 = vmatprep.subr.bf16.mxu0 %v3387_v34 }
 0x32a   :  { %v1038_v34 = vrot.slane %v4511_v62, %v1037_v12 }
 0x32c   :  { %2412 = vmatpush1.bf16.msra.mxu0 %v3385_v36 }
 0x32d   :  { %2413 = vmatprep.subr.bf16.mxu0 %v3390_v37 }
 0x330   :  { %2414 = vmatpush1.bf16.msra.mxu0 %v3388_v38 }
 0x331   :  { %2415 = vmatprep.subr.bf16.mxu0 %v3393_v39 }
 0x334   :  { %2416 = vmatpush1.bf16.msra.mxu0 %v3391_v40 }
 0x335   :  { %2417 = vmatprep.subr.bf16.mxu0 %v3396_v41 }
 0x338   :  { %2418 = vmatpush1.bf16.msra.mxu0 %v3394_v42 }
 0x339   :  { %2419 = vmatprep.subr.bf16.mxu0 %v3399_v43 }
 0x33c   :  { %2420 = vmatpush1.bf16.msra.mxu0 %v3397_v44 }
 0x33d   :  { %2421 = vmatprep.subr.bf16.mxu0 %v3402_v45 }
 0x340   :  { %2422 = vmatpush1.bf16.msra.mxu0 %v3400_v46 }
 0x341   :  { %2423 = vmatprep.subr.bf16.mxu0 %v3405_v47  ;;  %v1029_v47 = vsub.s32 4, %v3785_v32 }
 0x344   :  { %2424 = vmatpush1.bf16.msra.mxu0 %v3403_v48  ;;  %v1033_v48 = vsub.s32 5, %v3785_v32 }
 0x345   :  { %2425 = vmatprep.subr.bf16.mxu0 %v3408_v49  ;;  %v1030_v49 = vrot.slane %v4511_v62, %v1029_v47 }
 0x348   :  { %2426 = vmatpush1.bf16.msra.mxu0 %v3406_v50  ;;  %v1034_v50 = vrot.slane %v4511_v62, %v1033_v48 }
 0x349   :  { %2427 = vmatprep.subr.bf16.mxu0 %v3411_v53 }
 0x34c   :  { %2428 = vmatpush1.bf16.msra.mxu0 %v3409_v54 }
 0x34d   :  { %2429 = vmatprep.subr.bf16.mxu0 %v3414_v55 }
 0x350   :  { %2430 = vmatpush1.bf16.msra.mxu0 %v3412_v56 }
 0x351   :  { %2431 = vmatprep.subr.bf16.mxu0 %v3417_v58 }
 0x354   :  { %2432 = vmatpush1.bf16.msra.mxu0 %v3415_v59 }
 0x355   :  { %2433 = vmatprep.subr.bf16.mxu0 %v3420_v60 }
 0x358   :  { %2434 = vmatpush1.bf16.msra.mxu0 %v3418_v61 }
 0x35b   :  { %2436 = vmatmul.mubr.bf16.vlgmr.msra.gmra.mrb[8].mxu0 %v4217_v21 }
 0x3ae   :  { %v2273_v21 = vpop.f32.mrb[4].mxu0  ;;  %v2355_v4 = vpop.f32.mrb[12].mxu1 }
 0x3af   :  { %v2957_v5 = vadd.f32 %v2273_v21, %v1014_v63  ;;  %v2959_v7 = vadd.f32 %v2355_v4, %v1022_v0  ;;  %v2275_v8 = vpop.f32.mrb[5].mxu0  ;;  %v2357_v10 = vpop.f32.mrb[13].mxu1 }
 0x3b0   :  { %v2958_v11 = vadd.f32 %v2275_v8, %v1018_v2  ;;  %v2960_v51 = vadd.f32 %v2357_v10, %v1026_v3  ;;  %v2277_v33 = vpop.f32.mrb[6].mxu0  ;;  %v2359_v13 = vpop.f32.mrb[14].mxu1 }
 0x3b1   :  { %v2895_v14 = vmul.f32 -1.442695, %v2957_v5  ;;  %v2897_v15 = vmul.f32 -1.442695, %v2959_v7  ;;  %v2278_v1 = vpop.f32.mrb[7].mxu0  ;;  %v2360_v16 = vpop.f32.mrb[15].mxu1 }
 0x3b2   :  { %v2896_v57 = vmul.f32 -1.442695, %v2958_v11  ;;  %v2898_v35 = vmul.f32 -1.442695, %v2960_v51 }
 0x3b3   :  { %3421 = vpow2.f32 %v2895_v14 }
 0x3b4   :  { %3423 = vpow2.f32 %v2897_v15 }
 0x3b5   :  { %3425 = vpow2.f32 %v2896_v57 }
 0x3b6   :  { %3427 = vpow2.f32 %v2898_v35 }
 0x3bd   :  { %v3422_v52 = vpop.eup %3421 }
 0x3be   :  { %v3424_v17 = vpop.eup %3423  ;;  %v2545_v18 = vadd.f32 1.0, %v3422_v52 }
 0x3bf   :  { %v3426_v19 = vpop.eup %3425  ;;  %v2547_v20 = vadd.f32 1.0, %v3424_v17 }
 0x3c0   :  { %v3428_v22 = vpop.eup %3427  ;;  %3429 = vrcp.f32 %v2545_v18  ;;  %v2546_v23 = vadd.f32 1.0, %v3426_v19 }
 0x3c1   :  { %3431 = vrcp.f32 %v2547_v20  ;;  %v2548_v24 = vadd.f32 1.0, %v3428_v22 }
 0x3c2   :  { %3433 = vrcp.f32 %v2546_v23 }
 0x3c3   :  { %3435 = vrcp.f32 %v2548_v24 }
 0x3ca   :  { %v3430_v25 = vpop.eup %3429 }
 0x3cb   :  { %v3432_v26 = vpop.eup %3431  ;;  %2566 = vst [vmem:[#allocation2] sm:$0xff] %v3430_v25 }
 0x3cc   :  { %v3434_v27 = vpop.eup %3433  ;;  %2568 = vst [vmem:[#allocation2 + $0x10] sm:$0xff] %v3432_v26 }
 0x3cd   :  { %v3436_v28 = vpop.eup %3435  ;;  %2567 = vst [vmem:[#allocation2 + $0x8] sm:$0xff] %v3434_v27 }
 0x3ce   :  { %2569 = vst [vmem:[#allocation2 + $0x18] sm:$0xff] %v3436_v28 }
 0x3cf   :  { %v2921_v29 = vpop.f32.mrb[16].mxu1 }
 0x3d0   :  { %v2922_v6 = vpop.f32.mrb[17].mxu1 }
 0x3d1   :  { %v2923_v30 = vadd.f32 %v2922_v6, %v2921_v29  ;;  %v2924_v31 = vpop.f32.mrb[18].mxu1 }
 0x3d2   :  { %v2925_v9 = vpop.f32.mrb[19].mxu1 }
 0x3d3   :  { %v2479_v38 = vadd.f32 %v2923_v30, %v1038_v34 }
 0x3ef   :  { %v2943_v36 = vpop.f32.mrb[20].mxu1 }
 0x3f0   :  { %v2944_v37 = vpop.f32.mrb[21].mxu1 }
 0x3f1   :  { %v2945_v39 = vadd.f32 %v2944_v37, %v2943_v36  ;;  %v2946_v40 = vpop.f32.mrb[22].mxu1 }
 0x3f2   :  { %v2947_v41 = vpop.f32.mrb[23].mxu1 }
 0x3f3   :  { %v2519_v42 = vadd.f32 %v2945_v39, %v2479_v38 }
 0x3f5   :  { %v2901_v43 = vmul.f32 -1.442695, %v2519_v42 }
 0x3f7   :  { %3437 = vpow2.f32 %v2901_v43 }
 0x401   :  { %v3438_v44 = vpop.eup %3437 }
 0x402   :  { %v2551_v45 = vadd.f32 1.0, %v3438_v44 }
 0x404   :  { %3439 = vrcp.f32 %v2551_v45 }
 0x40e   :  { %v3440_v46 = vpop.eup %3439 }
 0x40f   :  { %2572 = vst [vmem:[#allocation2 + $0x30] sm:$0xff] %v3440_v46 }
 0x42e   :  { %v2437_v53 = vpop.f32.mrb[8].mxu0 }
 0x42f   :  { %v2961_v54 = vadd.f32 %v2437_v53, %v1030_v49  ;;  %v2439_v55 = vpop.f32.mrb[9].mxu0 }
 0x430   :  { %v2962_v56 = vadd.f32 %v2439_v55, %v1034_v50  ;;  %v2441_v58 = vpop.f32.mrb[10].mxu0 }
 0x431   :  { %v2899_v59 = vmul.f32 -1.442695, %v2961_v54  ;;  %v2442_v60 = vpop.f32.mrb[11].mxu0 }
 0x432   :  { %v2900_v61 = vmul.f32 -1.442695, %v2962_v56 }
 0x433   :  { %3441 = vpow2.f32 %v2899_v59 }
 0x434   :  { %3443 = vpow2.f32 %v2900_v61 }
 0x43d   :  { %v3442_v63 = vpop.eup %3441 }
 0x43e   :  { %v3444_v0 = vpop.eup %3443  ;;  %v2549_v2 = vadd.f32 1.0, %v3442_v63 }
 0x43f   :  { %v2550_v3 = vadd.f32 1.0, %v3444_v0 }
 0x440   :  { %3445 = vrcp.f32 %v2549_v2 }
 0x441   :  { %3447 = vrcp.f32 %v2550_v3 }
 0x44a   :  { %v3446_v32 = vpop.eup %3445 }
 0x44b   :  { %v3448_v62 = vpop.eup %3447  ;;  %2570 = vst [vmem:[#allocation2 + $0x20] sm:$0xff] %v3446_v32 }
 0x44c   :  { %2571 = vst [vmem:[#allocation2 + $0x28] sm:$0xff] %v3448_v62 }
 0x44d   :  { %3460 = shalt.err (!%p3457_p4)
}
 0x44e   :  { %s3461_s2 = scalar_lea.hbm %s4550_s9, 896 }
 0x44f   :  { %p3462_p5 = scmp.ne.s32.totalorder %s4550_s9, %s3461_s2  ;;  %p3465_p6 = scmp.lt.u32.totalorder %s3461_s2, %s4550_s9 }
 0x451   :  { %p3467_p7 = pnand %p3465_p6, %p3462_p5 }
 0x453   :  { %3470 = shalt.err (!%p3467_p7)
}
 0x454   :  { %2582 = dma.vmem_to_hbm [thread:$0]  %s2580_s8, 896, %s4550_s9, [#allocation3]  }
 0x455   :  { %3471 = dma.done.wait [#allocation3], 896  }
 0x456   :  { %3472 = vsyncadd [#allocation3], 4294966400 }
 0x457   :  { %2586 = vsyncpa [#allocation3], 1 }

</bundles_post_ra>
